<compile_context>
chip_gen: v6e
topology: v6e:2x2x1
jax: 0.10.0
libtpu: 0.0.40
codegen_flags: <defaults>
</compile_context>

<pallas_src>
import functools

import jax
import jax.numpy as jnp
from jax import lax
from jax.experimental import pallas as pl
from jax.experimental.pallas import tpu as pltpu


_SUBLANE = 8
_MAX_ROW_TILE = 512            # rows (M or S) per block
_MAX_N_TILE = 512              # dim_out per block
_MAX_K_UNTILED = 1024          # keep the reduction un-tiled up to this size
_K_TILE = 512                  # reduction tile when K > _MAX_K_UNTILED
_MIN_ROWS_FOR_PALLAS = 256     # below this, XLA's fused path beats kernel overhead
_VMEM_LIMIT = 32 * 1024 * 1024


def _round_up(x: int, m: int) -> int:
    return ((x + m - 1) // m) * m


def _row_tile(rows: int, prefer_split: bool) -> int:
    """Row (sublane-major) tile size; grid extent is pl.cdiv(rows, tile).

    When prefer_split is set we aim for >= 2 row blocks so both v7x TensorCores get
    work on a "parallel" grid axis, while keeping blocks as large as possible.
    """
    if prefer_split and rows > 2 * _SUBLANE:
        half = _round_up(pl.cdiv(rows, 2), _SUBLANE)
        return min(_MAX_ROW_TILE, half)
    return min(rows, _MAX_ROW_TILE)


# --------------------------------------------------------------------------------------
# Kernels
# --------------------------------------------------------------------------------------

_NT = (((1,), (1,)), ((), ()))   # contract the trailing (K / C) dim of both operands


def _single_k_fused_kernel(x_ref, w_ref, lb_ref, cat_ref, gw_ref, gb_ref, hw_ref,
                           o_ref):
    """2-D path, K untiled: out = (x@w.T + lb) * sigmoid(cat@gw.T + gb) + cat@hw.T."""
    acc = lax.dot_general(x_ref[...], w_ref[...], dimension_numbers=_NT,
                          preferred_element_type=jnp.float32)
    z = lax.dot_general(cat_ref[...], gw_ref[...], dimension_numbers=_NT,
                        preferred_element_type=jnp.float32)
    z = z + gb_ref[...].astype(jnp.float32)
    gate = 1.0 / (1.0 + jnp.exp(-z))                     # sigmoid: exp/recip -> EUP slot
    hbias = lax.dot_general(cat_ref[...], hw_ref[...], dimension_numbers=_NT,
                            preferred_element_type=jnp.float32)
    y = (acc + lb_ref[...].astype(jnp.float32)) * gate + hbias
    o_ref[...] = y.astype(o_ref.dtype)


def _single_k_pregate_kernel(x_ref, w_ref, lb_ref, gate_ref, hb_ref, o_ref):
    """K untiled, gate/bias precomputed (3-D path; gate/hb broadcast over rows)."""
    acc = lax.dot_general(x_ref[...], w_ref[...], dimension_numbers=_NT,
                          preferred_element_type=jnp.float32)
    y = (acc + lb_ref[...].astype(jnp.float32)) * gate_ref[...].astype(jnp.float32)
    y = y + hb_ref[...].astype(jnp.float32)
    o_ref[...] = y.astype(o_ref.dtype)


def _multi_k_pregate_kernel(k_axis, x_ref, w_ref, lb_ref, gate_ref, hb_ref, o_ref,
                            acc_ref):
    """K tiled (rare, K > 1024): f32 accumulator, epilogue on the last K step."""
    @pl.when(pl.program_id(k_axis) == 0)
    def _init():
        acc_ref[...] = jnp.zeros_like(acc_ref)

    acc_ref[...] += lax.dot_general(x_ref[...], w_ref[...], dimension_numbers=_NT,
                                    preferred_element_type=jnp.float32)

    @pl.when(pl.program_id(k_axis) == pl.num_programs(k_axis) - 1)
    def _finalize():
        y = acc_ref[...] + lb_ref[...].astype(jnp.float32)
        y = y * gate_ref[...].astype(jnp.float32) + hb_ref[...].astype(jnp.float32)
        o_ref[...] = y.astype(o_ref.dtype)


# --------------------------------------------------------------------------------------
# Wrappers
# --------------------------------------------------------------------------------------

def prepare_params(params):
    """One-time parameter prep: pre-pads layer_w along K when the reduction must be
    tiled (K > 1024), so the pad is not re-issued (an extra full weight HBM pass) on
    every forward call. A no-op copy otherwise."""
    p = dict(params)
    k = p["layer_w"].shape[1]
    if k > _MAX_K_UNTILED:
        kp = _round_up(k, _K_TILE)
        p["layer_w"] = jnp.pad(p["layer_w"], ((0, 0), (0, kp - k)))
    return p


def _hyper_gate_bias(cat, params):
    """Tiny (rows, C) x (C, N) hyper-network GEMMs + sigmoid, computed in XLA."""
    z = jnp.einsum("bc,nc->bn", cat, params["gate_w"]) + params["gate_b"]
    return jax.nn.sigmoid(z), jnp.einsum("bc,nc->bn", cat, params["hbias_w"])


def _xla_forward(x, cat, params):
    """Small-problem fast path: plain fused XLA expression (no Pallas overhead)."""
    gate, hbias = _hyper_gate_bias(cat, params)
    w = params["layer_w"][:, : x.shape[-1]]          # identity slice unless K-prepadded
    y = jnp.einsum("...k,nk->...n", x, w) + params["layer_b"]
    if x.ndim == 3:
        gate, hbias = gate[:, None, :], hbias[:, None, :]
    return y * gate + hbias


def _forward_2d_pallas(x, cat, params):
    """x: (M, K), cat: (M, C). Gate / hyper-bias are row-aligned with x."""
    M, K = x.shape
    w = params["layer_w"]
    N = w.shape[0]
    lb = params["layer_b"].reshape(1, N)
    C = cat.shape[-1]

    tm = _row_tile(M, prefer_split=True)
    tn = min(N, _MAX_N_TILE)
    gm, gn = pl.cdiv(M, tm), pl.cdiv(N, tn)
    single_k = K <= _MAX_K_UNTILED

    if single_k and C <= _MAX_K_UNTILED:
        # Fully fused: hyper GEMMs + sigmoid in the epilogue -> no (M, N) gate/bias
        # arrays ever hit HBM.
        gw = params["gate_w"]
        gb = params["gate_b"].reshape(1, N)
        hw = params["hbias_w"]
        grid = (gn, gm, 1)
        in_specs = [
            pl.BlockSpec((tm, K), lambda j, i, k: (i, 0)),    # x rows
            pl.BlockSpec((tn, K), lambda j, i, k: (j, 0)),    # layer weight (resident)
            pl.BlockSpec((1, tn), lambda j, i, k: (0, j)),    # layer bias
            pl.BlockSpec((tm, C), lambda j, i, k: (i, 0)),    # cat rows
            pl.BlockSpec((tn, C), lambda j, i, k: (j, 0)),    # gate weight
            pl.BlockSpec((1, tn), lambda j, i, k: (0, j)),    # gate bias
            pl.BlockSpec((tn, C), lambda j, i, k: (j, 0)),    # hyper-bias weight
        ]
        args = (x, w, lb, cat, gw, gb, hw)
        kernel = _single_k_fused_kernel
        scratch = []
    else:
        # Rare paths (K > 1024 or huge conditioning dim): precompute gate/bias in XLA.
        gate, hbias = _hyper_gate_bias(cat, params)           # (M, N)
        if single_k:
            tk, gk = K, 1
        else:
            kp = _round_up(K, _K_TILE)
            if w.shape[1] != kp:                              # unprepared params
                w = jnp.pad(w, ((0, 0), (0, kp - w.shape[1])))
            if K != kp:                                       # K tail must be zeros
                x = jnp.pad(x, ((0, 0), (0, kp - K)))
            tk, gk = _K_TILE, kp // _K_TILE
        grid = (gn, gm, gk)
        in_specs = [
            pl.BlockSpec((tm, tk), lambda j, i, k: (i, k)),
            pl.BlockSpec((tn, tk), lambda j, i, k: (j, k)),
            pl.BlockSpec((1, tn), lambda j, i, k: (0, j)),
            pl.BlockSpec((tm, tn), lambda j, i, k: (i, j)),
            pl.BlockSpec((tm, tn), lambda j, i, k: (i, j)),
        ]
        args = (x, w, lb, gate, hbias)
        if gk == 1:
            kernel = _single_k_pregate_kernel
            scratch = []
        else:
            kernel = functools.partial(_multi_k_pregate_kernel, 2)
            scratch = [pltpu.VMEM((tm, tn), jnp.float32)]

    return pl.pallas_call(
        kernel,
        out_shape=jax.ShapeDtypeStruct((M, N), x.dtype),
        grid=grid,
        in_specs=in_specs,
        out_specs=pl.BlockSpec((tm, tn), lambda j, i, k: (i, j)),
        scratch_shapes=scratch,
        compiler_params=pltpu.CompilerParams(
            dimension_semantics=("parallel", "parallel", "arbitrary"),
            vmem_limit_bytes=_VMEM_LIMIT),
    )(*args)


def _forward_3d_pallas(x, gate, hbias, params):
    """x: (B, S, K); gate/hbias: (B, N) per batch, broadcast over S inside the kernel."""
    B, S, K = x.shape
    w = params["layer_w"]
    N = w.shape[0]
    lb = params["layer_b"].reshape(1, N)

    ts = _row_tile(S, prefer_split=(B == 1))
    tn = min(N, _MAX_N_TILE)
    gs, gn = pl.cdiv(S, ts), pl.cdiv(N, tn)

    if K <= _MAX_K_UNTILED:
        tk, gk = K, 1
        kernel = _single_k_pregate_kernel
        scratch = []
    else:
        kp = _round_up(K, _K_TILE)
        if w.shape[1] != kp:                                  # unprepared params
            w = jnp.pad(w, ((0, 0), (0, kp - w.shape[1])))
        if K != kp:
            x = jnp.pad(x, ((0, 0), (0, 0), (0, kp - K)))
        tk, gk = _K_TILE, kp // _K_TILE
        kernel = functools.partial(_multi_k_pregate_kernel, 3)
        scratch = [pltpu.VMEM((ts, tn), jnp.float32)]

    grid = (gn, B, gs, gk)
    in_specs = [
        pl.BlockSpec((None, ts, tk), lambda j, b, s, k: (b, s, k)),   # x (batch squeezed)
        pl.BlockSpec((tn, tk), lambda j, b, s, k: (j, k)),            # layer weight
        pl.BlockSpec((1, tn), lambda j, b, s, k: (0, j)),             # layer bias
        pl.BlockSpec((1, tn), lambda j, b, s, k: (b, j)),             # per-batch gate
        pl.BlockSpec((1, tn), lambda j, b, s, k: (b, j)),             # per-batch hyper bias
    ]
    return pl.pallas_call(
        kernel,
        out_shape=jax.ShapeDtypeStruct((B, S, N), x.dtype),
        grid=grid,
        in_specs=in_specs,
        out_specs=pl.BlockSpec((None, ts, tn), lambda j, b, s, k: (b, s, j)),
        scratch_shapes=scratch,
        compiler_params=pltpu.CompilerParams(
            dimension_semantics=("parallel", "parallel", "parallel", "arbitrary"),
            vmem_limit_bytes=_VMEM_LIMIT),
    )(x, w, lb, gate, hbias)


def spk_emo_linear_forward(x, t, spk_emb, emo_emb, params, *,
                           min_rows_for_pallas: int = _MIN_ROWS_FOR_PALLAS):
    """Pallas forward of SpkEmoLinear.

    x: (B, dim_in) or (B, S, dim_in); t: (B, 1); spk_emb: (B, dim_spk); emo_emb: (B, dim_emo)
    params: layer_w (dim_out, dim_in), layer_b (dim_out,), gate_w (dim_out, C),
            gate_b (dim_out,), hbias_w (dim_out, C) with C = 1 + dim_spk + dim_emo.
    Optionally pass params through prepare_params() once to hoist the (rare) K pad.
    """
    cat = jnp.concatenate([spk_emb, emo_emb, t], axis=-1)
    rows = x.shape[0] if x.ndim == 2 else x.shape[0] * x.shape[1]
    if rows < min_rows_for_pallas:
        return _xla_forward(x, cat, params)       # kernel overhead dominates here
    if x.ndim == 2:
        return _forward_2d_pallas(x, cat, params)
    gate, hbias = _hyper_gate_bias(cat, params)   # tiny (B, N): keep in XLA (per review)
    return _forward_3d_pallas(x, gate, hbias, params)


# --------------------------------------------------------------------------------------
# Reference + test
# --------------------------------------------------------------------------------------

def _reference(x, t, spk_emb, emo_emb, params):
    """Pure-JAX reference mirroring the PyTorch module."""
    cat = jnp.concatenate([spk_emb, emo_emb, t], axis=-1)
    gate = jax.nn.sigmoid(cat @ params["gate_w"].T + params["gate_b"])
    bias = cat @ params["hbias_w"].T
    y = x @ params["layer_w"].T + params["layer_b"]
    if x.ndim == 3:
        gate = gate[:, None, :]
        bias = bias[:, None, :]
    return y * gate + bias


def _make_params(key, d_in, d_out, d_c):
    ks = jax.random.split(key, 5)

    def u(k, shape, fan_in):
        b = 1.0 / (fan_in ** 0.5)
        return jax.random.uniform(k, shape, jnp.float32, -b, b)

    return {
        "layer_w": u(ks[0], (d_out, d_in), d_in),
        "layer_b": u(ks[1], (d_out,), d_in),
        "gate_w": u(ks[2], (d_out, d_c), d_c),
        "gate_b": u(ks[3], (d_out,), d_c),
        "hbias_w": u(ks[4], (d_out, d_c), d_c),
    }


def _make_inputs(key, batch, seq, d_in, d_spk, d_emo):
    ks = jax.random.split(key, 4)
    shape = (batch, d_in) if seq is None else (batch, seq, d_in)
    x = jax.random.normal(ks[0], shape, jnp.float32)
    t = jax.random.uniform(ks[1], (batch, 1), dtype=jnp.float32)
    spk = jax.random.normal(ks[2], (batch, d_spk), jnp.float32)
    emo = jax.random.normal(ks[3], (batch, d_emo), jnp.float32)
    return x, t, spk, emo


if __name__ == "__main__":
    d_spk, d_emo = 32, 16
    d_c = 1 + d_spk + d_emo

    # (name, batch, seq, dim_in, dim_out, tolerance)
    cases = [
        ("2d_small_xla_fastpath", 4, None, 80, 96, 1e-4),     # documented 2-D case
        ("3d_small_xla_fastpath", 4, 8, 80, 96, 1e-4),
        ("2d_pallas_fused", 600, None, 80, 96, 1e-3),         # ragged M, fused hyper-nets
        ("3d_pallas", 2, 640, 80, 96, 1e-3),                  # ragged S, per-batch gate
        ("2d_pallas_ktiled", 320, None, 1300, 96, 3e-3),      # K-tiled accumulator path
    ]

    root = jax.random.PRNGKey(0)
    for idx, (name, batch, seq, d_in, d_out, tol) in enumerate(cases):
        kp, kd = jax.random.split(jax.random.fold_in(root, idx))
        params = _make_params(kp, d_in, d_out, d_c)
        prepared = prepare_params(params)
        x, t, spk, emo = _make_inputs(kd, batch, seq, d_in, d_spk, d_emo)

        out = jax.block_until_ready(spk_emo_linear_forward(x, t, spk, emo, prepared))
        ref = _reference(x, t, spk, emo, params)

        assert out.shape == ref.shape, (name, out.shape, ref.shape)
        max_err = float(jnp.max(jnp.abs(out - ref)))
        assert jnp.allclose(out, ref, atol=tol, rtol=tol), (
            f"{name}: max|err| = {max_err:.3e}")

    print("KERNEL_OK")
</pallas_src>

<mosaic_0001>
module attributes {stable_mosaic.version = 11 : i64} {
  func.func @_single_k_fused_kernel(%arg0: i32, %arg1: i32, %arg2: i32, %arg3: memref<304x80xf32, #tpu.memory_space<vmem>>, %arg4: memref<96x80xf32, #tpu.memory_space<vmem>>, %arg5: memref<1x96xf32, #tpu.memory_space<vmem>>, %arg6: memref<304x49xf32, #tpu.memory_space<vmem>>, %arg7: memref<96x49xf32, #tpu.memory_space<vmem>>, %arg8: memref<1x96xf32, #tpu.memory_space<vmem>>, %arg9: memref<96x49xf32, #tpu.memory_space<vmem>>, %arg10: memref<304x96xf32, #tpu.memory_space<vmem>>) attributes {dimension_semantics = [#tpu.dimension_semantics<parallel>, #tpu.dimension_semantics<parallel>, #tpu.dimension_semantics<arbitrary>], iteration_bounds = array<i64: 1, 2, 1>, scalar_prefetch = 0 : i64, scratch_operands = 0 : i64, tpu.core_type = #tpu.core_type<tc>, window_params = [{transform_indices = @transform_0, window_bounds = array<i64: 304, 80>}, {transform_indices = @transform_1, window_bounds = array<i64: 96, 80>}, {transform_indices = @transform_2, window_bounds = array<i64: 1, 96>}, {transform_indices = @transform_3, window_bounds = array<i64: 304, 49>}, {transform_indices = @transform_4, window_bounds = array<i64: 96, 49>}, {transform_indices = @transform_5, window_bounds = array<i64: 1, 96>}, {transform_indices = @transform_6, window_bounds = array<i64: 96, 49>}, {transform_indices = @transform_7, window_bounds = array<i64: 304, 96>}]} {
    %c0 = arith.constant 0 : index
    %c0_0 = arith.constant 0 : index
    %0 = vector.load %arg3[%c0, %c0_0] : memref<304x80xf32, #tpu.memory_space<vmem>>, vector<304x80xf32>
    %c0_1 = arith.constant 0 : index
    %c0_2 = arith.constant 0 : index
    %1 = vector.load %arg4[%c0_1, %c0_2] : memref<96x80xf32, #tpu.memory_space<vmem>>, vector<96x80xf32>
    %cst = arith.constant dense<0.000000e+00> : vector<304x96xf32>
    %2 = tpu.matmul %0, %1, %cst {dimension_numbers = #tpu.dot_dimension_numbers<[1], [1], [0], [0], [0, 0, 1, 0], [], []>} : vector<304x80xf32>, vector<96x80xf32>, vector<304x96xf32> -> vector<304x96xf32>
    %c0_3 = arith.constant 0 : index
    %c0_4 = arith.constant 0 : index
    %3 = vector.load %arg6[%c0_3, %c0_4] : memref<304x49xf32, #tpu.memory_space<vmem>>, vector<304x49xf32>
    %c0_5 = arith.constant 0 : index
    %c0_6 = arith.constant 0 : index
    %4 = vector.load %arg7[%c0_5, %c0_6] : memref<96x49xf32, #tpu.memory_space<vmem>>, vector<96x49xf32>
    %cst_7 = arith.constant dense<0.000000e+00> : vector<304x96xf32>
    %5 = tpu.matmul %3, %4, %cst_7 {dimension_numbers = #tpu.dot_dimension_numbers<[1], [1], [0], [0], [0, 0, 1, 0], [], []>} : vector<304x49xf32>, vector<96x49xf32>, vector<304x96xf32> -> vector<304x96xf32>
    %c0_8 = arith.constant 0 : index
    %c0_9 = arith.constant 0 : index
    %6 = vector.load %arg8[%c0_8, %c0_9] : memref<1x96xf32, #tpu.memory_space<vmem>>, vector<1x96xf32>
    %7 = vector.broadcast %6 : vector<1x96xf32> to vector<304x96xf32>
    %8 = arith.addf %5, %7 : vector<304x96xf32>
    %cst_10 = arith.constant 0.000000e+00 : f32
    %9 = vector.broadcast %cst_10 : f32 to vector<304x96xf32>
    %10 = arith.subf %9, %8 : vector<304x96xf32>
    %11 = math.exp %10 : vector<304x96xf32>
    %cst_11 = arith.constant 1.000000e+00 : f32
    %12 = vector.broadcast %cst_11 : f32 to vector<304x96xf32>
    %13 = arith.addf %12, %11 : vector<304x96xf32>
    %cst_12 = arith.constant 1.000000e+00 : f32
    %14 = vector.broadcast %cst_12 : f32 to vector<304x96xf32>
    %15 = arith.divf %14, %13 : vector<304x96xf32>
    %c0_13 = arith.constant 0 : index
    %c0_14 = arith.constant 0 : index
    %16 = vector.load %arg6[%c0_13, %c0_14] : memref<304x49xf32, #tpu.memory_space<vmem>>, vector<304x49xf32>
    %c0_15 = arith.constant 0 : index
    %c0_16 = arith.constant 0 : index
    %17 = vector.load %arg9[%c0_15, %c0_16] : memref<96x49xf32, #tpu.memory_space<vmem>>, vector<96x49xf32>
    %cst_17 = arith.constant dense<0.000000e+00> : vector<304x96xf32>
    %18 = tpu.matmul %16, %17, %cst_17 {dimension_numbers = #tpu.dot_dimension_numbers<[1], [1], [0], [0], [0, 0, 1, 0], [], []>} : vector<304x49xf32>, vector<96x49xf32>, vector<304x96xf32> -> vector<304x96xf32>
    %c0_18 = arith.constant 0 : index
    %c0_19 = arith.constant 0 : index
    %19 = vector.load %arg5[%c0_18, %c0_19] : memref<1x96xf32, #tpu.memory_space<vmem>>, vector<1x96xf32>
    %20 = vector.broadcast %19 : vector<1x96xf32> to vector<304x96xf32>
    %21 = arith.addf %2, %20 : vector<304x96xf32>
    %22 = arith.mulf %21, %15 : vector<304x96xf32>
    %23 = arith.addf %22, %18 : vector<304x96xf32>
    %c0_20 = arith.constant 0 : index
    %c0_21 = arith.constant 0 : index
    %24 = vector.load %arg10[%c0_20, %c0_21] : memref<304x96xf32, #tpu.memory_space<vmem>>, vector<304x96xf32>
    tpu.vector_store %arg10[%c0_20, %c0_21], %23 {strides = array<i32>} : memref<304x96xf32, #tpu.memory_space<vmem>>, vector<304x96xf32>,
    return
  }
  func.func @transform_0(%arg0: i32, %arg1: i32, %arg2: i32) -> (i32, i32) {
    %c0_i32 = arith.constant 0 : i32
    %c0_i32_0 = arith.constant 0 : i32
    return %arg1, %c0_i32 : i32, i32
  }
  func.func @transform_1(%arg0: i32, %arg1: i32, %arg2: i32) -> (i32, i32) {
    %c0_i32 = arith.constant 0 : i32
    %c0_i32_0 = arith.constant 0 : i32
    return %arg0, %c0_i32 : i32, i32
  }
  func.func @transform_2(%arg0: i32, %arg1: i32, %arg2: i32) -> (i32, i32) {
    %c0_i32 = arith.constant 0 : i32
    %c0_i32_0 = arith.constant 0 : i32
    return %c0_i32, %arg0 : i32, i32
  }
  func.func @transform_3(%arg0: i32, %arg1: i32, %arg2: i32) -> (i32, i32) {
    %c0_i32 = arith.constant 0 : i32
    %c0_i32_0 = arith.constant 0 : i32
    return %arg1, %c0_i32 : i32, i32
  }
  func.func @transform_4(%arg0: i32, %arg1: i32, %arg2: i32) -> (i32, i32) {
    %c0_i32 = arith.constant 0 : i32
    %c0_i32_0 = arith.constant 0 : i32
    return %arg0, %c0_i32 : i32, i32
  }
  func.func @transform_5(%arg0: i32, %arg1: i32, %arg2: i32) -> (i32, i32) {
    %c0_i32 = arith.constant 0 : i32
    %c0_i32_0 = arith.constant 0 : i32
    return %c0_i32, %arg0 : i32, i32
  }
  func.func @transform_6(%arg0: i32, %arg1: i32, %arg2: i32) -> (i32, i32) {
    %c0_i32 = arith.constant 0 : i32
    %c0_i32_0 = arith.constant 0 : i32
    return %arg0, %c0_i32 : i32, i32
  }
  func.func @transform_7(%arg0: i32, %arg1: i32, %arg2: i32) -> (i32, i32) {
    %c0_i32 = arith.constant 0 : i32
    return %arg1, %arg0 : i32, i32
  }
}

</mosaic_0001>

<bundles_post_ra>
// kernel: tpu_custom_call.1
= control target key start
LH: loop header
LB: loop body
LE: loop exit
PB: predicated region body
PF: predicated region fallthrough
CT: control target
= control target key end

     0   :  { %s3487_s24 = smov 0   ;;  %s3489_s25 = smov 0   ;;  %s4448_s0 = inlined_call_operand.vmem [shape: f32[600,80], index: 0, kind: input, shape index: {}]   ;;  %s4449_s1 = inlined_call_operand.vmem [shape: f32[96,80], index: 1, kind: input, shape index: {}]   ;;  %s4450_s2 = inlined_call_operand.vmem [shape: f32[1,96], index: 2, kind: input, shape index: {}]   ;;  %s4451_s3 = inlined_call_operand.vmem [shape: f32[600,49], index: 3, kind: input, shape index: {}]   ;;  %s4452_s4 = inlined_call_operand.vmem [shape: f32[96,49], index: 4, kind: input, shape index: {}]   ;;  %s4453_s5 = inlined_call_operand.vmem [shape: f32[1,96], index: 5, kind: input, shape index: {}]   ;;  %s4454_s6 = inlined_call_operand.vmem [shape: f32[96,49], index: 6, kind: input, shape index: {}]   ;;  %s4455_s7 = inlined_call_operand.vmem [shape: f32[600,96], index: 7, kind: output, shape index: {}]  }
   0x1   :  { %s3491_s26 = smov 0   ;;  %s3493_s27 = smov 0  }
   0x2   :  { %s3495_s28 = smov 0  }
   0x3 LB: > { %s2487_s29 = sadd.s32 4294967295, %s3413_s28   ;;  %s32_s30 = sadd.s32 1, %s3409_s27  ;;  %s3413_s28 = sphi %s3495_s28, %s17_s28   ;;  %s3409_s27 = sphi %s3493_s27, %s4497_s27   ;;  %s3405_s26 = sphi %s3491_s26, %s4496_s26   ;;  %s3401_s25 = sphi %s3489_s25, %s4495_s25   ;;  %s3397_s24 = sphi %s3487_s24, %s4494_s24  }
   0x4   : > { %p34_p0 = scmp.ge.s32.totalorder %s32_s30, 2  ;;  %s227_s8 = sadd.s32 1, %s3401_s25 }
   0x5   : > { %p237_p1 = scmp.ne.s32.totalorder %s3401_s25, %s3397_s24  ;;  %p238_p2 = scmp.eq.s32.totalorder %s2487_s29, 1 }
   0x6   : > { %s4499_s30 = smov (%p34_p0, %s32_s30), 0  ;;  %p2496_p4 = scmp.ge.s32.totalorder %s3413_s28, 1 }
   0x7   : > { %p3519_p3 = por %p238_p2, %p237_p1  ;;  %s222_s10 = ssub.s32 %s3409_s27, %s4499_s30 }
   0x8   : > { %p335_p5 = scmp.lt.s32.totalorder %s3413_s28, 3  ;;  %p225_p6 = scmp.eq.s32.totalorder %s222_s10, 0 }
   0xa   : > { %p336_p7 = pnand %p2496_p4, %p335_p5 }
   0xb   : > { %s3528_s11 = scalar_select %p225_p6, %s3401_s25, %s227_s8  }
   0xc   : > { %339 = sbr.rel (%p336_p7) target bundleno = 445 (0x1bd), region = 48 }
  0x11   : > { %v556_v0 = vld [vmem:[%s4452_s4 + $0x58] sm:$0xff]  ;;  %vm564_vm0 = vcmask 400384   ;;  %v555_v2 = vld [vmem:[%s4452_s4 + $0x50] sm:$0xff]  ;;  %s3540_s18 = smul.u32 38, %s3405_s26  ;;  %v554_v4 = vld [vmem:[%s4452_s4 + $0x48] sm:$0xff]  ;;  %vm1508_vm1 = vcmask 654336  }
  0x12   : > { %v1209_v1 = vld [vmem:[%s4454_s6 + $0x58] sm:$0xff]  ;;  %2814 = vmatprep.subr.msk.mxu0 %vm564_vm0, %v556_v0  ;;  %v1208_v3 = vld [vmem:[%s4454_s6 + $0x50] sm:$0xff]  ;;  %v1207_v5 = vld [vmem:[%s4454_s6 + $0x48] sm:$0xff]  ;;  %vm1990_vm2 = vcmask 785408   ;;  %s2663_s16 = smul.u32 (%p3519_p3), 304, %s3405_s26 }
  0x13   : > { %2895 = vmatprep.subr.msk.mxu1 %vm564_vm0, %v1209_v1  ;;  %2815 = vmatpush3.xpose.msk.msra.mxu0 %vm564_vm0, %v556_v0  ;;  %p405_p8 = scmp.lt.s32.totalorder %s3540_s18, 74  ;;  %v553_v6 = vld [vmem:[%s4452_s4 + $0x40] sm:$0xff]  ;;  %v552_v9 = vld [vmem:[%s4452_s4 + $0x38] sm:$0xff]  ;;  %v551_v11 = vld [vmem:[%s4452_s4 + $0x30] sm:$0xff]  ;;  %s2037_s15 = ssub.s32 (%p3519_p3), 75, %s3540_s18 }
  0x14   : > { %2896 = vmatpush3.xpose.msk.msra.mxu1 %vm564_vm0, %v1209_v1  ;;  %2816 = vmatprep.subr.msk.mxu0 %vm564_vm0, %v555_v2  ;;  %v1206_v7 = vld [vmem:[%s4454_s6 + $0x40] sm:$0xff]  ;;  %v1205_v10 = vld [vmem:[%s4454_s6 + $0x38] sm:$0xff]  ;;  %v1204_v12 = vld [vmem:[%s4454_s6 + $0x30] sm:$0xff]  ;;  %p2038_p9 = scmp.lt.s32.totalorder (%p3519_p3), %s2037_s15, 38  ;;  %s4301_s20 = scalar_lea.vmem (%p3519_p3), %s4455_s7, %s2663_s16  }
  0x15   : > { %2897 = vmatprep.subr.msk.mxu1 %vm564_vm0, %v1208_v3  ;;  %s3559_s8 = scalar_select %p405_p8, %s3540_s18, 74  ;;  %v550_v13 = vld [vmem:[%s4452_s4 + $0x28] sm:$0xff]  ;;  %v549_v15 = vld [vmem:[%s4452_s4 + $0x20] sm:$0xff]  ;;  %v548_v17 = vld [vmem:[%s4452_s4 + $0x18] sm:$0xff] }
  0x16   : > { %v1203_v14 = vld [vmem:[%s4454_s6 + $0x28] sm:$0xff]  ;;  %v1202_v16 = vld [vmem:[%s4454_s6 + $0x20] sm:$0xff]  ;;  %v1201_v18 = vld [vmem:[%s4454_s6 + $0x18] sm:$0xff] }
  0x17   : > { %2817 = vmatpush3.xpose.msk.msra.mxu0 %vm564_vm0, %v555_v2  ;;  %s2497_s10 = sshll.u32 %s3559_s8, 3  ;;  %v547_v19 = vld [vmem:[%s4452_s4 + $0x10] sm:$0xff]  ;;  %v546_v21 = vld [vmem:[%s4452_s4 + $0x8] sm:$0xff]  ;;  %v545_v23 = vld [vmem:[%s4452_s4] sm:$0xff] }
  0x18   : > { %2898 = vmatpush3.xpose.msk.msra.mxu1 %vm564_vm0, %v1208_v3  ;;  %2818 = vmatprep.subr.msk.mxu0 %vm564_vm0, %v554_v4  ;;  %s3571_s14 = scalar_lea.vmem %s4451_s3, %s2497_s10  ;;  %v1200_v20 = vld [vmem:[%s4454_s6 + $0x10] sm:$0xff]  ;;  %v1199_v22 = vld [vmem:[%s4454_s6 + $0x8] sm:$0xff]  ;;  %v1198_v24 = vld [vmem:[%s4454_s6] sm:$0xff]  ;;  %s3861_s23 = scalar_lea.vmem %s4448_s0, %s2497_s10 }
  0x19   : > { %2899 = vmatprep.subr.msk.mxu1 %vm564_vm0, %v1207_v5  ;;  %v507_v8 = vld [vmem:[%s3571_s14] sm:$0xff]  ;;  %v506_v25 = vld [vmem:[%s4449_s1 + $0x58] sm:$0xff]  ;;  %v508_v26 = vld [vmem:[%s3571_s14 + $0x8] sm:$0xff] }
  0x1a   : > { %2838 = vmatprep.mubr.msk.f32.mxu0 %vm564_vm0, %v507_v8  ;;  %2919 = vmatprep.mubr.msk.f32.mxu1 %vm564_vm0, %v507_v8  ;;  %v509_v27 = vld [vmem:[%s3571_s14 + $0x10] sm:$0xff]  ;;  %v510_v29 = vld [vmem:[%s3571_s14 + $0x18] sm:$0xff]  ;;  %v511_v30 = vld [vmem:[%s3571_s14 + $0x20] sm:$0xff] }
  0x1b   : > { %2819 = vmatpush3.xpose.msk.msra.mxu0 %vm564_vm0, %v554_v4  ;;  %v505_v28 = vld [vmem:[%s4449_s1 + $0x50] sm:$0xff]  ;;  %v504_v31 = vld [vmem:[%s4449_s1 + $0x48] sm:$0xff]  ;;  %v503_v34 = vld [vmem:[%s4449_s1 + $0x40] sm:$0xff] }
  0x1c   : > { %2900 = vmatpush3.xpose.msk.msra.mxu1 %vm564_vm0, %v1207_v5  ;;  %2820 = vmatprep.subr.msk.mxu0 %vm564_vm0, %v553_v6  ;;  %v512_v32 = vld [vmem:[%s3571_s14 + $0x28] sm:$0xff]  ;;  %v513_v33 = vld [vmem:[%s3571_s14 + $0x30] sm:$0xff]  ;;  %v514_v35 = vld [vmem:[%s3571_s14 + $0x38] sm:$0xff] }
  0x1d   : > { %2901 = vmatprep.subr.msk.mxu1 %vm564_vm0, %v1206_v7  ;;  %v515_v36 = vld [vmem:[%s3571_s14 + $0x40] sm:$0xff]  ;;  %v502_v37 = vld [vmem:[%s4449_s1 + $0x38] sm:$0xff]  ;;  %v516_v38 = vld [vmem:[%s3571_s14 + $0x48] sm:$0xff] }
  0x1e   : > { %v517_v39 = vld [vmem:[%s3571_s14 + $0x50] sm:$0xff]  ;;  %v518_v41 = vld [vmem:[%s3571_s14 + $0x58] sm:$0xff]  ;;  %v519_v42 = vld [vmem:[%s3571_s14 + $0x60] sm:$0xff] }
  0x1f   : > { %2821 = vmatpush3.xpose.msk.msra.mxu0 %vm564_vm0, %v553_v6  ;;  %v501_v40 = vld [vmem:[%s4449_s1 + $0x30] sm:$0xff]  ;;  %v500_v43 = vld [vmem:[%s4449_s1 + $0x28] sm:$0xff]  ;;  %v499_v46 = vld [vmem:[%s4449_s1 + $0x20] sm:$0xff] }
  0x20   : > { %2902 = vmatpush3.xpose.msk.msra.mxu1 %vm564_vm0, %v1206_v7  ;;  %2822 = vmatprep.subr.msk.mxu0 %vm564_vm0, %v552_v9  ;;  %v520_v44 = vld [vmem:[%s3571_s14 + $0x68] sm:$0xff]  ;;  %v521_v45 = vld [vmem:[%s3571_s14 + $0x70] sm:$0xff]  ;;  %v522_v47 = vld [vmem:[%s3571_s14 + $0x78] sm:$0xff] }
  0x21   : > { %2903 = vmatprep.subr.msk.mxu1 %vm564_vm0, %v1205_v10  ;;  %v523_v48 = vld [vmem:[%s3571_s14 + $0x80] sm:$0xff]  ;;  %v498_v49 = vld [vmem:[%s4449_s1 + $0x18] sm:$0xff]  ;;  %v524_v50 = vld [vmem:[%s3571_s14 + $0x88] sm:$0xff] }
  0x22   : > { %v525_v51 = vld [vmem:[%s3571_s14 + $0x90] sm:$0xff]  ;;  %v526_v53 = vld [vmem:[%s3571_s14 + $0x98] sm:$0xff]  ;;  %v527_v54 = vld [vmem:[%s3571_s14 + $0xa0] sm:$0xff] }
  0x23   : > { %2823 = vmatpush3.xpose.msk.msra.mxu0 %vm564_vm0, %v552_v9  ;;  %v497_v52 = vld [vmem:[%s4449_s1 + $0x10] sm:$0xff]  ;;  %v496_v55 = vld [vmem:[%s4449_s1 + $0x8] sm:$0xff]  ;;  %v495_v58 = vld [vmem:[%s4449_s1] sm:$0xff] }
  0x24   : > { %2904 = vmatpush3.xpose.msk.msra.mxu1 %vm564_vm0, %v1205_v10  ;;  %2824 = vmatprep.subr.msk.mxu0 %vm564_vm0, %v551_v11  ;;  %v528_v56 = vld [vmem:[%s3571_s14 + $0xa8] sm:$0xff]  ;;  %v529_v57 = vld [vmem:[%s3571_s14 + $0xb0] sm:$0xff]  ;;  %v530_v59 = vld [vmem:[%s3571_s14 + $0xb8] sm:$0xff] }
  0x25   : > { %2905 = vmatprep.subr.msk.mxu1 %vm564_vm0, %v1204_v12  ;;  %v531_v60 = vld [vmem:[%s3571_s14 + $0xc0] sm:$0xff]  ;;  %v532_v61 = vld [vmem:[%s3571_s14 + $0xc8] sm:$0xff]  ;;  %v533_v62 = vld [vmem:[%s3571_s14 + $0xd0] sm:$0xff] }
  0x26   : > { %v534_v63 = vld [vmem:[%s3571_s14 + $0xd8] sm:$0xff]  ;;  %v535_v0 = vld [vmem:[%s3571_s14 + $0xe0] sm:$0xff]  ;;  %v536_v1 = vld [vmem:[%s3571_s14 + $0xe8] sm:$0xff] }
  0x27   : > { %2825 = vmatpush3.xpose.msk.msra.mxu0 %vm564_vm0, %v551_v11  ;;  %v537_v2 = vld [vmem:[%s3571_s14 + $0xf0] sm:$0xff]  ;;  %v538_v3 = vld [vmem:[%s3571_s14 + $0xf8] sm:$0xff]  ;;  %v539_v4 = vld [vmem:[%s3571_s14 + $0x100] sm:$0xff] }
  0x28   : > { %2906 = vmatpush3.xpose.msk.msra.mxu1 %vm564_vm0, %v1204_v12  ;;  %2826 = vmatprep.subr.msk.mxu0 %vm564_vm0, %v550_v13  ;;  %v540_v5 = vld [vmem:[%s3571_s14 + $0x108] sm:$0xff]  ;;  %v541_v6 = vld [vmem:[%s3571_s14 + $0x110] sm:$0xff]  ;;  %v542_v7 = vld [vmem:[%s3571_s14 + $0x118] sm:$0xff] }
  0x29   : > { %2907 = vmatprep.subr.msk.mxu1 %vm564_vm0, %v1203_v14  ;;  %v543_v8 = vld [vmem:[%s3571_s14 + $0x120] sm:$0xff]  ;;  %v544_v9 = vld [vmem:[%s3571_s14 + $0x128] sm:$0xff]  ;;  %s397_s14 = sand.u32 1, %s3397_s24  }
  0x2a   : > { %v457_v10 = vld [vmem:[%s3861_s23] sm:$0xff]  ;;  %v458_v12 = vld [vmem:[%s3861_s23 + $0x8] sm:$0xff]  ;;  %s4111_s24 = smul.u32 304, %s397_s14 }
  0x2b   : > { %2827 = vmatpush3.xpose.msk.msra.mxu0 %vm564_vm0, %v550_v13  ;;  %v477_v11 = vld [vmem:[%s3861_s23 + $0xa0] sm:$0xff]  ;;  %v478_v13 = vld [vmem:[%s3861_s23 + $0xa8] sm:$0xff] }
  0x2c   : > { %2908 = vmatpush3.xpose.msk.msra.mxu1 %vm564_vm0, %v1203_v14  ;;  %2828 = vmatprep.subr.msk.mxu0 %vm564_vm0, %v549_v15  ;;  %v459_v14 = vld [vmem:[%s3861_s23 + $0x10] sm:$0xff]  ;;  %s4126_s13 = scalar_lea.vmem [#allocation2], %s4111_s24  }
  0x2d   : > { %2909 = vmatprep.subr.msk.mxu1 %vm564_vm0, %v1202_v16 }
  0x2f   : > { %2829 = vmatpush3.xpose.msk.msra.mxu0 %vm564_vm0, %v549_v15  ;;  %v479_v15 = vld [vmem:[%s3861_s23 + $0xb0] sm:$0xff] }
  0x30   : > { %2910 = vmatpush3.xpose.msk.msra.mxu1 %vm564_vm0, %v1202_v16  ;;  %2830 = vmatprep.subr.msk.mxu0 %vm564_vm0, %v548_v17  ;;  %v460_v16 = vld [vmem:[%s3861_s23 + $0x18] sm:$0xff] }
  0x31   : > { %2911 = vmatprep.subr.msk.mxu1 %vm564_vm0, %v1201_v18 }
  0x33   : > { %2831 = vmatpush3.xpose.msk.msra.mxu0 %vm564_vm0, %v548_v17  ;;  %v480_v17 = vld [vmem:[%s3861_s23 + $0xb8] sm:$0xff] }
  0x34   : > { %2912 = vmatpush3.xpose.msk.msra.mxu1 %vm564_vm0, %v1201_v18  ;;  %2832 = vmatprep.subr.msk.mxu0 %vm564_vm0, %v547_v19  ;;  %v461_v18 = vld [vmem:[%s3861_s23 + $0x20] sm:$0xff] }
  0x35   : > { %2913 = vmatprep.subr.msk.mxu1 %vm564_vm0, %v1200_v20 }
  0x37   : > { %2833 = vmatpush3.xpose.msk.msra.mxu0 %vm564_vm0, %v547_v19  ;;  %v481_v19 = vld [vmem:[%s3861_s23 + $0xc0] sm:$0xff] }
  0x38   : > { %2914 = vmatpush3.xpose.msk.msra.mxu1 %vm564_vm0, %v1200_v20  ;;  %2834 = vmatprep.subr.msk.mxu0 %vm564_vm0, %v546_v21  ;;  %v462_v20 = vld [vmem:[%s3861_s23 + $0x28] sm:$0xff] }
  0x39   : > { %2915 = vmatprep.subr.msk.mxu1 %vm564_vm0, %v1199_v22 }
  0x3b   : > { %2835 = vmatpush3.xpose.msk.msra.mxu0 %vm564_vm0, %v546_v21  ;;  %v482_v21 = vld [vmem:[%s3861_s23 + $0xc8] sm:$0xff] }
  0x3c   : > { %2916 = vmatpush3.xpose.msk.msra.mxu1 %vm564_vm0, %v1199_v22  ;;  %2836 = vmatprep.subr.msk.mxu0 %vm564_vm0, %v545_v23  ;;  %v463_v22 = vld [vmem:[%s3861_s23 + $0x30] sm:$0xff] }
  0x3d   : > { %2917 = vmatprep.subr.msk.mxu1 %vm564_vm0, %v1198_v24 }
  0x3f   : > { %2837 = vmatpush3.xpose.msk.msra.mxu0 %vm564_vm0, %v545_v23  ;;  %v483_v23 = vld [vmem:[%s3861_s23 + $0xd0] sm:$0xff] }
  0x40   : > { %2918 = vmatpush3.xpose.msk.msra.mxu1 %vm564_vm0, %v1198_v24  ;;  %2976 = vmatprep.subr.msk.mxu0 %vm1508_vm1, %v506_v25  ;;  %v464_v24 = vld [vmem:[%s3861_s23 + $0x38] sm:$0xff] }
  0x41   : > { %3057 = vmatprep.subr.msk.mxu1 %vm1508_vm1, %v506_v25 }
  0x42   : > { %2839 = vmatmul.mubr.msk.f32.vlgmr.msra.gmra.mxu0 %vm564_vm0, %v508_v26 }
  0x43   : > { %2920 = vmatmul.mubr.msk.f32.vlgmr.msra.gmra.mxu1 %vm564_vm0, %v508_v26  ;;  %2977 = vmatpush3.xpose.msk.msra.mxu0 %vm1508_vm1, %v506_v25  ;;  %v465_v26 = vld [vmem:[%s3861_s23 + $0x40] sm:$0xff] }
  0x44   : > { %2841 = vmatprep.mubr.msk.f32.mxu0 %vm564_vm0, %v509_v27  ;;  %2922 = vmatprep.mubr.msk.f32.mxu1 %vm564_vm0, %v509_v27  ;;  %v485_v27 = vld [vmem:[%s3861_s23 + $0xe0] sm:$0xff] }
  0x45   : > { %3069 = vmatpush3.xpose.msk.msra.mxu1 %vm1508_vm1, %v506_v25  ;;  %2978 = vmatprep.subr.msk.mxu0 %vm1508_vm1, %v505_v28  ;;  %v484_v25 = vld [vmem:[%s3861_s23 + $0xd8] sm:$0xff] }
  0x46   : > { %3058 = vmatprep.subr.msk.mxu1 %vm1508_vm1, %v505_v28  ;;  %2842 = vmatmul.mubr.msk.f32.gmra.mxu0 %vm564_vm0, %v510_v29 }
  0x47   : > { %2923 = vmatmul.mubr.msk.f32.gmra.mxu1 %vm564_vm0, %v510_v29  ;;  %2844 = vmatprep.mubr.msk.f32.mxu0 %vm564_vm0, %v511_v30  ;;  %v486_v29 = vld [vmem:[%s3861_s23 + $0xe8] sm:$0xff] }
  0x48   : > { %2925 = vmatprep.mubr.msk.f32.mxu1 %vm564_vm0, %v511_v30  ;;  %2979 = vmatpush3.xpose.msk.msra.mxu0 %vm1508_vm1, %v505_v28  ;;  %v467_v30 = vld [vmem:[%s3861_s23 + $0x50] sm:$0xff] }
  0x49   : > { %3070 = vmatpush3.xpose.msk.msra.mxu1 %vm1508_vm1, %v505_v28  ;;  %2980 = vmatprep.subr.msk.mxu0 %vm1508_vm1, %v504_v31  ;;  %v466_v28 = vld [vmem:[%s3861_s23 + $0x48] sm:$0xff] }
  0x4a   : > { %3059 = vmatprep.subr.msk.mxu1 %vm1508_vm1, %v504_v31  ;;  %2845 = vmatmul.mubr.msk.f32.gmra.mxu0 %vm564_vm0, %v512_v32 }
  0x4b   : > { %2926 = vmatmul.mubr.msk.f32.gmra.mxu1 %vm564_vm0, %v512_v32  ;;  %2847 = vmatprep.mubr.msk.f32.mxu0 %vm564_vm0, %v513_v33  ;;  %v468_v32 = vld [vmem:[%s3861_s23 + $0x58] sm:$0xff] }
  0x4c   : > { %2928 = vmatprep.mubr.msk.f32.mxu1 %vm564_vm0, %v513_v33  ;;  %2981 = vmatpush3.xpose.msk.msra.mxu0 %vm1508_vm1, %v504_v31  ;;  %v488_v33 = vld [vmem:[%s3861_s23 + $0xf8] sm:$0xff] }
  0x4d   : > { %3071 = vmatpush3.xpose.msk.msra.mxu1 %vm1508_vm1, %v504_v31  ;;  %2982 = vmatprep.subr.msk.mxu0 %vm1508_vm1, %v503_v34  ;;  %v487_v31 = vld [vmem:[%s3861_s23 + $0xf0] sm:$0xff] }
  0x4e   : > { %3060 = vmatprep.subr.msk.mxu1 %vm1508_vm1, %v503_v34  ;;  %2848 = vmatmul.mubr.msk.f32.gmra.mxu0 %vm564_vm0, %v514_v35 }
  0x4f   : > { %2929 = vmatmul.mubr.msk.f32.gmra.mxu1 %vm564_vm0, %v514_v35  ;;  %2850 = vmatprep.mubr.msk.f32.mxu0 %vm564_vm0, %v515_v36  ;;  %v489_v35 = vld [vmem:[%s3861_s23 + $0x100] sm:$0xff] }
  0x50   : > { %2931 = vmatprep.mubr.msk.f32.mxu1 %vm564_vm0, %v515_v36  ;;  %2983 = vmatpush3.xpose.msk.msra.mxu0 %vm1508_vm1, %v503_v34  ;;  %v470_v36 = vld [vmem:[%s3861_s23 + $0x68] sm:$0xff] }
  0x51   : > { %3072 = vmatpush3.xpose.msk.msra.mxu1 %vm1508_vm1, %v503_v34  ;;  %2984 = vmatprep.subr.msk.mxu0 %vm1508_vm1, %v502_v37  ;;  %v469_v34 = vld [vmem:[%s3861_s23 + $0x60] sm:$0xff] }
  0x52   : > { %3061 = vmatprep.subr.msk.mxu1 %vm1508_vm1, %v502_v37  ;;  %2851 = vmatmul.mubr.msk.f32.gmra.mxu0 %vm564_vm0, %v516_v38 }
  0x53   : > { %2932 = vmatmul.mubr.msk.f32.gmra.mxu1 %vm564_vm0, %v516_v38  ;;  %2853 = vmatprep.mubr.msk.f32.mxu0 %vm564_vm0, %v517_v39  ;;  %v471_v38 = vld [vmem:[%s3861_s23 + $0x70] sm:$0xff] }
  0x54   : > { %2934 = vmatprep.mubr.msk.f32.mxu1 %vm564_vm0, %v517_v39  ;;  %2985 = vmatpush3.xpose.msk.msra.mxu0 %vm1508_vm1, %v502_v37  ;;  %v491_v39 = vld [vmem:[%s3861_s23 + $0x110] sm:$0xff] }
  0x55   : > { %3073 = vmatpush3.xpose.msk.msra.mxu1 %vm1508_vm1, %v502_v37  ;;  %2986 = vmatprep.subr.msk.mxu0 %vm1508_vm1, %v501_v40  ;;  %v490_v37 = vld [vmem:[%s3861_s23 + $0x108] sm:$0xff] }
  0x56   : > { %3062 = vmatprep.subr.msk.mxu1 %vm1508_vm1, %v501_v40  ;;  %2854 = vmatmul.mubr.msk.f32.gmra.mxu0 %vm564_vm0, %v518_v41 }
  0x57   : > { %2935 = vmatmul.mubr.msk.f32.gmra.mxu1 %vm564_vm0, %v518_v41  ;;  %2856 = vmatprep.mubr.msk.f32.mxu0 %vm564_vm0, %v519_v42  ;;  %v492_v41 = vld [vmem:[%s3861_s23 + $0x118] sm:$0xff] }
  0x58   : > { %2937 = vmatprep.mubr.msk.f32.mxu1 %vm564_vm0, %v519_v42  ;;  %2987 = vmatpush3.xpose.msk.msra.mxu0 %vm1508_vm1, %v501_v40  ;;  %v473_v42 = vld [vmem:[%s3861_s23 + $0x80] sm:$0xff] }
  0x59   : > { %3074 = vmatpush3.xpose.msk.msra.mxu1 %vm1508_vm1, %v501_v40  ;;  %2988 = vmatprep.subr.msk.mxu0 %vm1508_vm1, %v500_v43  ;;  %v472_v40 = vld [vmem:[%s3861_s23 + $0x78] sm:$0xff] }
  0x5a   : > { %3063 = vmatprep.subr.msk.mxu1 %vm1508_vm1, %v500_v43  ;;  %2857 = vmatmul.mubr.msk.f32.gmra.mxu0 %vm564_vm0, %v520_v44 }
  0x5b   : > { %2938 = vmatmul.mubr.msk.f32.gmra.mxu1 %vm564_vm0, %v520_v44  ;;  %2859 = vmatprep.mubr.msk.f32.mxu0 %vm564_vm0, %v521_v45  ;;  %v474_v44 = vld [vmem:[%s3861_s23 + $0x88] sm:$0xff] }
  0x5c   : > { %2940 = vmatprep.mubr.msk.f32.mxu1 %vm564_vm0, %v521_v45  ;;  %2989 = vmatpush3.xpose.msk.msra.mxu0 %vm1508_vm1, %v500_v43  ;;  %v494_v45 = vld [vmem:[%s3861_s23 + $0x128] sm:$0xff] }
  0x5d   : > { %3075 = vmatpush3.xpose.msk.msra.mxu1 %vm1508_vm1, %v500_v43  ;;  %2990 = vmatprep.subr.msk.mxu0 %vm1508_vm1, %v499_v46  ;;  %v493_v43 = vld [vmem:[%s3861_s23 + $0x120] sm:$0xff] }
  0x5e   : > { %3064 = vmatprep.subr.msk.mxu1 %vm1508_vm1, %v499_v46  ;;  %2860 = vmatmul.mubr.msk.f32.gmra.mxu0 %vm564_vm0, %v522_v47 }
  0x5f   : > { %2941 = vmatmul.mubr.msk.f32.gmra.mxu1 %vm564_vm0, %v522_v47  ;;  %2862 = vmatprep.mubr.msk.f32.mxu0 %vm564_vm0, %v523_v48  ;;  %v476_v47 = vld [vmem:[%s3861_s23 + $0x98] sm:$0xff] }
  0x60   : > { %2943 = vmatprep.mubr.msk.f32.mxu1 %vm564_vm0, %v523_v48  ;;  %2991 = vmatpush3.xpose.msk.msra.mxu0 %vm1508_vm1, %v499_v46  ;;  %v3949_v48 = vld [vmem:[%s4453_s5] ss:$0 sm:$0xff] }
  0x61   : > { %3076 = vmatpush3.xpose.msk.msra.mxu1 %vm1508_vm1, %v499_v46  ;;  %2992 = vmatprep.subr.msk.mxu0 %vm1508_vm1, %v498_v49  ;;  %v475_v46 = vld [vmem:[%s3861_s23 + $0x90] sm:$0xff] }
  0x62   : > { %3065 = vmatprep.subr.msk.mxu1 %vm1508_vm1, %v498_v49  ;;  %2863 = vmatmul.mubr.msk.f32.gmra.mxu0 %vm564_vm0, %v524_v50 }
  0x63   : > { %2944 = vmatmul.mubr.msk.f32.gmra.mxu1 %vm564_vm0, %v524_v50  ;;  %2865 = vmatprep.mubr.msk.f32.mxu0 %vm564_vm0, %v525_v51 }
  0x64   : > { %2946 = vmatprep.mubr.msk.f32.mxu1 %vm564_vm0, %v525_v51  ;;  %2993 = vmatpush3.xpose.msk.msra.mxu0 %vm1508_vm1, %v498_v49 }
  0x65   : > { %3077 = vmatpush3.xpose.msk.msra.mxu1 %vm1508_vm1, %v498_v49  ;;  %2994 = vmatprep.subr.msk.mxu0 %vm1508_vm1, %v497_v52 }
  0x66   : > { %3066 = vmatprep.subr.msk.mxu1 %vm1508_vm1, %v497_v52  ;;  %2866 = vmatmul.mubr.msk.f32.gmra.mxu0 %vm564_vm0, %v526_v53 }
  0x67   : > { %2947 = vmatmul.mubr.msk.f32.gmra.mxu1 %vm564_vm0, %v526_v53  ;;  %2868 = vmatprep.mubr.msk.f32.mxu0 %vm564_vm0, %v527_v54 }
  0x68   : > { %2949 = vmatprep.mubr.msk.f32.mxu1 %vm564_vm0, %v527_v54  ;;  %2995 = vmatpush3.xpose.msk.msra.mxu0 %vm1508_vm1, %v497_v52 }
  0x69   : > { %3078 = vmatpush3.xpose.msk.msra.mxu1 %vm1508_vm1, %v497_v52  ;;  %2996 = vmatprep.subr.msk.mxu0 %vm1508_vm1, %v496_v55 }
  0x6a   : > { %3067 = vmatprep.subr.msk.mxu1 %vm1508_vm1, %v496_v55  ;;  %2869 = vmatmul.mubr.msk.f32.gmra.mxu0 %vm564_vm0, %v528_v56 }
  0x6b   : > { %2950 = vmatmul.mubr.msk.f32.gmra.mxu1 %vm564_vm0, %v528_v56  ;;  %2871 = vmatprep.mubr.msk.f32.mxu0 %vm564_vm0, %v529_v57 }
  0x6c   : > { %2952 = vmatprep.mubr.msk.f32.mxu1 %vm564_vm0, %v529_v57  ;;  %2997 = vmatpush3.xpose.msk.msra.mxu0 %vm1508_vm1, %v496_v55 }
  0x6d   : > { %3079 = vmatpush3.xpose.msk.msra.mxu1 %vm1508_vm1, %v496_v55  ;;  %2998 = vmatprep.subr.msk.mxu0 %vm1508_vm1, %v495_v58 }
  0x6e   : > { %3068 = vmatprep.subr.msk.mxu1 %vm1508_vm1, %v495_v58  ;;  %2872 = vmatmul.mubr.msk.f32.gmra.mxu0 %vm564_vm0, %v530_v59 }
  0x6f   : > { %2953 = vmatmul.mubr.msk.f32.gmra.mxu1 %vm564_vm0, %v530_v59  ;;  %2874 = vmatprep.mubr.msk.f32.mxu0 %vm564_vm0, %v531_v60 }
  0x70   : > { %2955 = vmatprep.mubr.msk.f32.mxu1 %vm564_vm0, %v531_v60  ;;  %2999 = vmatpush3.xpose.msk.msra.mxu0 %vm1508_vm1, %v495_v58 }
  0x71   : > { %3080 = vmatpush3.xpose.msk.msra.mxu1 %vm1508_vm1, %v495_v58 }
  0x72   : > { %2875 = vmatmul.mubr.msk.f32.gmra.mxu0 %vm564_vm0, %v532_v61 }
  0x73   : > { %2956 = vmatmul.mubr.msk.f32.gmra.mxu1 %vm564_vm0, %v532_v61  ;;  %2877 = vmatprep.mubr.msk.f32.mxu0 %vm564_vm0, %v533_v62 }
  0x74   : > { %2958 = vmatprep.mubr.msk.f32.mxu1 %vm564_vm0, %v533_v62 }
  0x76   : > { %2878 = vmatmul.mubr.msk.f32.gmra.mxu0 %vm564_vm0, %v534_v63 }
  0x77   : > { %2959 = vmatmul.mubr.msk.f32.gmra.mxu1 %vm564_vm0, %v534_v63  ;;  %2880 = vmatprep.mubr.msk.f32.mxu0 %vm564_vm0, %v535_v0 }
  0x78   : > { %2961 = vmatprep.mubr.msk.f32.mxu1 %vm564_vm0, %v535_v0 }
  0x7a   : > { %2881 = vmatmul.mubr.msk.f32.gmra.mxu0 %vm564_vm0, %v536_v1 }
  0x7b   : > { %2962 = vmatmul.mubr.msk.f32.gmra.mxu1 %vm564_vm0, %v536_v1  ;;  %2883 = vmatprep.mubr.msk.f32.mxu0 %vm564_vm0, %v537_v2 }
  0x7c   : > { %2964 = vmatprep.mubr.msk.f32.mxu1 %vm564_vm0, %v537_v2 }
  0x7e   : > { %2884 = vmatmul.mubr.msk.f32.gmra.mxu0 %vm564_vm0, %v538_v3 }
  0x7f   : > { %2965 = vmatmul.mubr.msk.f32.gmra.mxu1 %vm564_vm0, %v538_v3  ;;  %2886 = vmatprep.mubr.msk.f32.mxu0 %vm564_vm0, %v539_v4 }
  0x80   : > { %2967 = vmatprep.mubr.msk.f32.mxu1 %vm564_vm0, %v539_v4 }
  0x82   : > { %2887 = vmatmul.mubr.msk.f32.gmra.mxu0 %vm564_vm0, %v540_v5 }
  0x83   : > { %2968 = vmatmul.mubr.msk.f32.gmra.mxu1 %vm564_vm0, %v540_v5  ;;  %2889 = vmatprep.mubr.msk.f32.mxu0 %vm564_vm0, %v541_v6 }
  0x84   : > { %2970 = vmatprep.mubr.msk.f32.mxu1 %vm564_vm0, %v541_v6 }
  0x86   : > { %2890 = vmatmul.mubr.msk.f32.gmra.mxu0 %vm564_vm0, %v542_v7 }
  0x87   : > { %2971 = vmatmul.mubr.msk.f32.gmra.mxu1 %vm564_vm0, %v542_v7  ;;  %2892 = vmatprep.mubr.msk.f32.mxu0 %vm564_vm0, %v543_v8 }
  0x88   : > { %2973 = vmatprep.mubr.msk.f32.mxu1 %vm564_vm0, %v543_v8 }
  0x8a   : > { %2893 = vmatmul.mubr.msk.f32.gmra.mxu0 %vm564_vm0, %v544_v9 }
  0x8b   : > { %2974 = vmatmul.mubr.msk.f32.gmra.mxu1 %vm564_vm0, %v544_v9  ;;  %3000 = vmatprep.mubr.msk.f32.mxu0 %vm1508_vm1, %v457_v10 }
  0x8c   : > { %3030 = vmatprep.mubr.msk.f32.mxu1 %vm1508_vm1, %v477_v11 }
  0x8e   : > { %3001 = vmatmul.mubr.msk.f32.vlgmr.msra.gmra.mxu0 %vm1508_vm1, %v458_v12 }
  0x8f   : > { %3031 = vmatmul.mubr.msk.f32.vlgmr.msra.gmra.mxu1 %vm1508_vm1, %v478_v13  ;;  %3003 = vmatprep.mubr.msk.f32.mxu0 %vm1508_vm1, %v459_v14 }
  0x90   : > { %3033 = vmatprep.mubr.msk.f32.mxu1 %vm1508_vm1, %v479_v15 }
  0x92   : > { %3004 = vmatmul.mubr.msk.f32.gmra.mxu0 %vm1508_vm1, %v460_v16 }
  0x93   : > { %3034 = vmatmul.mubr.msk.f32.gmra.mxu1 %vm1508_vm1, %v480_v17  ;;  %3006 = vmatprep.mubr.msk.f32.mxu0 %vm1508_vm1, %v461_v18 }
  0x94   : > { %3036 = vmatprep.mubr.msk.f32.mxu1 %vm1508_vm1, %v481_v19 }
  0x96   : > { %3007 = vmatmul.mubr.msk.f32.gmra.mxu0 %vm1508_vm1, %v462_v20 }
  0x97   : > { %3037 = vmatmul.mubr.msk.f32.gmra.mxu1 %vm1508_vm1, %v482_v21  ;;  %3009 = vmatprep.mubr.msk.f32.mxu0 %vm1508_vm1, %v463_v22 }
  0x98   : > { %3039 = vmatprep.mubr.msk.f32.mxu1 %vm1508_vm1, %v483_v23 }
  0x9a   : > { %3010 = vmatmul.mubr.msk.f32.gmra.mxu0 %vm1508_vm1, %v464_v24 }
  0x9b   : > { %3040 = vmatmul.mubr.msk.f32.gmra.mxu1 %vm1508_vm1, %v484_v25  ;;  %3012 = vmatprep.mubr.msk.f32.mxu0 %vm1508_vm1, %v465_v26 }
  0x9c   : > { %3042 = vmatprep.mubr.msk.f32.mxu1 %vm1508_vm1, %v485_v27 }
  0x9e   : > { %3013 = vmatmul.mubr.msk.f32.gmra.mxu0 %vm1508_vm1, %v466_v28 }
  0x9f   : > { %3043 = vmatmul.mubr.msk.f32.gmra.mxu1 %vm1508_vm1, %v486_v29  ;;  %3015 = vmatprep.mubr.msk.f32.mxu0 %vm1508_vm1, %v467_v30 }
  0xa0   : > { %3045 = vmatprep.mubr.msk.f32.mxu1 %vm1508_vm1, %v487_v31 }
  0xa2   : > { %3016 = vmatmul.mubr.msk.f32.gmra.mxu0 %vm1508_vm1, %v468_v32 }
  0xa3   : > { %3046 = vmatmul.mubr.msk.f32.gmra.mxu1 %vm1508_vm1, %v488_v33  ;;  %3018 = vmatprep.mubr.msk.f32.mxu0 %vm1508_vm1, %v469_v34 }
  0xa4   : > { %3048 = vmatprep.mubr.msk.f32.mxu1 %vm1508_vm1, %v489_v35 }
  0xa6   : > { %3019 = vmatmul.mubr.msk.f32.gmra.mxu0 %vm1508_vm1, %v470_v36 }
  0xa7   : > { %3049 = vmatmul.mubr.msk.f32.gmra.mxu1 %vm1508_vm1, %v490_v37  ;;  %3021 = vmatprep.mubr.msk.f32.mxu0 %vm1508_vm1, %v471_v38 }
  0xa8   : > { %3051 = vmatprep.mubr.msk.f32.mxu1 %vm1508_vm1, %v491_v39 }
  0xaa   : > { %3022 = vmatmul.mubr.msk.f32.gmra.mxu0 %vm1508_vm1, %v472_v40 }
  0xab   : > { %3052 = vmatmul.mubr.msk.f32.gmra.mxu1 %vm1508_vm1, %v492_v41  ;;  %3024 = vmatprep.mubr.msk.f32.mxu0 %vm1508_vm1, %v473_v42 }
  0xac   : > { %3054 = vmatprep.mubr.msk.f32.mxu1 %vm1508_vm1, %v493_v43 }
  0xae   : > { %3025 = vmatmul.mubr.msk.f32.gmra.mxu0 %vm1508_vm1, %v474_v44 }
  0xaf   : > { %3055 = vmatmul.mubr.msk.f32.gmra.mxu1 %vm1508_vm1, %v494_v45  ;;  %3027 = vmatprep.mubr.msk.f32.mxu0 %vm1508_vm1, %v475_v46 }
  0xb2   : > { %3028 = vmatmul.mubr.msk.f32.gmra.mxu0 %vm1508_vm1, %v476_v47 }
 0x102   : > { %v2840_v49 = vpop.f32.mrf.mxu0 }
 0x103   : > { %v3951_v50 = vpop.f32.mrf.mxu1  ;;  %v787_v51 = vadd.f32 %v2840_v49, %v3949_v48 }
 0x104   : > { %v781_v52 = vpop.f32.mrf.mxu0 }
 0x105   : > { %v3954_v53 = vpop.f32.mrf.mxu1  ;;  %v971_v54 = vsub.f32 0.0, %v787_v51  ;;  %v782_v55 = vadd.f32 %v3949_v48, %v781_v52 }
 0x106   : > { %v2843_v56 = vpop.f32.mrf.mxu0 }
 0x107   : > { %v3957_v57 = vpop.f32.mrf.mxu1  ;;  %v1010_v58 = vmul.f32 1.442695, %v971_v54  ;;  %v970_v59 = vsub.f32 0.0, %v782_v55  ;;  %v797_v60 = vadd.f32 %v2843_v56, %v3949_v48 }
 0x108   : > { %v791_v61 = vpop.f32.mrf.mxu0 }
 0x109   : > { %v3960_v62 = vpop.f32.mrf.mxu1  ;;  %v1008_v63 = vmul.f32 1.442695, %v970_v59  ;;  %v973_v0 = vsub.f32 0.0, %v797_v60  ;;  %v792_v1 = vadd.f32 %v3949_v48, %v791_v61  ;;  %3187 = vpow2.f32 %v1010_v58 }
 0x10a   : > { %v2846_v2 = vpop.f32.mrf.mxu0 }
 0x10b   : > { %v3963_v3 = vpop.f32.mrf.mxu1  ;;  %v1014_v4 = vmul.f32 1.442695, %v973_v0  ;;  %v972_v5 = vsub.f32 0.0, %v792_v1  ;;  %v807_v6 = vadd.f32 %v2846_v2, %v3949_v48  ;;  %3189 = vpow2.f32 %v1008_v63 }
 0x10c   : > { %v801_v7 = vpop.f32.mrf.mxu0 }
 0x10d   : > { %v3966_v8 = vpop.f32.mrf.mxu1  ;;  %v1012_v9 = vmul.f32 1.442695, %v972_v5  ;;  %v975_v10 = vsub.f32 0.0, %v807_v6  ;;  %v802_v11 = vadd.f32 %v3949_v48, %v801_v7  ;;  %3191 = vpow2.f32 %v1014_v4 }
 0x10e   : > { %v2849_v12 = vpop.f32.mrf.mxu0 }
 0x10f   : > { %v3969_v13 = vpop.f32.mrf.mxu1  ;;  %v1018_v14 = vmul.f32 1.442695, %v975_v10  ;;  %v974_v15 = vsub.f32 0.0, %v802_v11  ;;  %v817_v16 = vadd.f32 %v2849_v12, %v3949_v48  ;;  %3193 = vpow2.f32 %v1012_v9 }
 0x110   : > { %v811_v17 = vpop.f32.mrf.mxu0 }
 0x111   : > { %v3972_v18 = vpop.f32.mrf.mxu1  ;;  %v1016_v19 = vmul.f32 1.442695, %v974_v15  ;;  %v977_v20 = vsub.f32 0.0, %v817_v16  ;;  %v812_v21 = vadd.f32 %v3949_v48, %v811_v17  ;;  %3195 = vpow2.f32 %v1018_v14 }
 0x112   : > { %v2852_v22 = vpop.f32.mrf.mxu0 }
 0x113   : > { %v3975_v23 = vpop.f32.mrf.mxu1  ;;  %v1022_v24 = vmul.f32 1.442695, %v977_v20  ;;  %v976_v25 = vsub.f32 0.0, %v812_v21  ;;  %v827_v26 = vadd.f32 %v2852_v22, %v3949_v48  ;;  %3197 = vpow2.f32 %v1016_v19 }
 0x114   : > { %v821_v27 = vpop.f32.mrf.mxu0 }
 0x115   : > { %v3978_v28 = vpop.f32.mrf.mxu1  ;;  %v1020_v29 = vmul.f32 1.442695, %v976_v25  ;;  %v979_v30 = vsub.f32 0.0, %v827_v26  ;;  %v822_v31 = vadd.f32 %v3949_v48, %v821_v27  ;;  %3199 = vpow2.f32 %v1022_v24 }
 0x116   : > { %v2855_v32 = vpop.f32.mrf.mxu0  ;;  %v3188_v36 = vpop.eup %3187 }
 0x117   : > { %v3981_v33 = vpop.f32.mrf.mxu1  ;;  %v1026_v34 = vmul.f32 1.442695, %v979_v30  ;;  %v978_v35 = vsub.f32 0.0, %v822_v31  ;;  %3201 = vpow2.f32 %v1020_v29  ;;  %v837_v37 = vadd.f32 %v2855_v32, %v3949_v48 }
 0x118   : > { %v831_v38 = vpop.f32.mrf.mxu0  ;;  %v3190_v42 = vpop.eup %3189  ;;  %v1085_v46 = vadd.f32 1.0, %v3188_v36 }
 0x119   : > { %v3984_v39 = vpop.f32.mrf.mxu1  ;;  %v1024_v40 = vmul.f32 1.442695, %v978_v35  ;;  %v832_v41 = vadd.f32 %v3949_v48, %v831_v38  ;;  %3203 = vpow2.f32 %v1026_v34  ;;  %v981_v43 = vsub.f32 0.0, %v837_v37 }
 0x11a   : > { %v2858_v44 = vpop.f32.mrf.mxu0  ;;  %v3192_v51 = vpop.eup %3191  ;;  %v1084_v56 = vadd.f32 1.0, %v3190_v42 }
 0x11b   : > { %v3987_v45 = vpop.f32.mrf.mxu1  ;;  %v980_v47 = vsub.f32 0.0, %v832_v41  ;;  %v847_v49 = vadd.f32 %v2858_v44, %v3949_v48  ;;  %3205 = vpow2.f32 %v1024_v40  ;;  %v1030_v52 = vmul.f32 1.442695, %v981_v43 }
 0x11c   : > { %v841_v54 = vpop.f32.mrf.mxu0  ;;  %v3194_v60 = vpop.eup %3193  ;;  %v1087_v1 = vadd.f32 1.0, %v3192_v51 }
 0x11d   : > { %v3990_v55 = vpop.f32.mrf.mxu1  ;;  %v1028_v58 = vmul.f32 1.442695, %v980_v47  ;;  %v983_v59 = vsub.f32 0.0, %v847_v49  ;;  %3207 = vpow2.f32 %v1030_v52  ;;  %v842_v61 = vadd.f32 %v3949_v48, %v841_v54 }
 0x11e   : > { %4457 = vst [vmem:[#allocation3_spill] sm:$0xff] %v3990_v55  ;;  %v2861_v63 = vpop.f32.mrf.mxu0  ;;  %3209 = vrcp.f32 %v1085_v46  ;;  %v3196_v5 = vpop.eup %3195  ;;  %v1086_v11 = vadd.f32 1.0, %v3194_v60 }
 0x11f   : > { %v3993_v0 = vpop.f32.mrf.mxu1  ;;  %v1034_v2 = vmul.f32 1.442695, %v983_v59  ;;  %v857_v4 = vadd.f32 %v2861_v63, %v3949_v48  ;;  %3211 = vpow2.f32 %v1028_v58  ;;  %v982_v6 = vsub.f32 0.0, %v842_v61 }
 0x120   : > { %4458 = vst [vmem:[#allocation4_spill] sm:$0xff] %v3993_v0  ;;  %v851_v7 = vpop.f32.mrf.mxu0  ;;  %v3198_v10 = vpop.eup %3197  ;;  %3213 = vrcp.f32 %v1084_v56  ;;  %v1089_v20 = vadd.f32 1.0, %v3196_v5 }
 0x121   : > { %v3996_v9 = vpop.f32.mrf.mxu1  ;;  %v985_v12 = vsub.f32 0.0, %v857_v4  ;;  %v852_v14 = vadd.f32 %v3949_v48, %v851_v7  ;;  %3215 = vpow2.f32 %v1034_v2  ;;  %v1032_v15 = vmul.f32 1.442695, %v982_v6 }
 0x122   : > { %4459 = vst [vmem:[#allocation5_spill] sm:$0xff] %v3996_v9  ;;  %v2864_v16 = vpop.f32.mrf.mxu0  ;;  %v3200_v19 = vpop.eup %3199  ;;  %3217 = vrcp.f32 %v1087_v1  ;;  %v1088_v24 = vadd.f32 1.0, %v3198_v10 }
 0x123   : > { %v3999_v17 = vpop.f32.mrf.mxu1  ;;  %v1038_v21 = vmul.f32 1.442695, %v985_v12  ;;  %v984_v22 = vsub.f32 0.0, %v852_v14  ;;  %3219 = vpow2.f32 %v1032_v15  ;;  %v867_v25 = vadd.f32 %v2864_v16, %v3949_v48 }
 0x124   : > { %4460 = vst [vmem:[#allocation6_spill] sm:$0xff] %v3999_v17  ;;  %v861_v26 = vpop.f32.mrf.mxu0  ;;  %v3202_v29 = vpop.eup %3201  ;;  %3221 = vrcp.f32 %v1086_v11  ;;  %v1091_v32 = vadd.f32 1.0, %v3200_v19 }
 0x125   : > { %v4002_v27 = vpop.f32.mrf.mxu1  ;;  %v1036_v30 = vmul.f32 1.442695, %v984_v22  ;;  %v862_v31 = vadd.f32 %v3949_v48, %v861_v26  ;;  %3223 = vpow2.f32 %v1038_v21  ;;  %v987_v34 = vsub.f32 0.0, %v867_v25 }
 0x126   : > { %4461 = vst [vmem:[#allocation7_spill] sm:$0xff] %v4002_v27  ;;  %v2867_v35 = vpop.f32.mrf.mxu0  ;;  %v3204_v37 = vpop.eup %3203  ;;  %3225 = vrcp.f32 %v1089_v20  ;;  %v1090_v41 = vadd.f32 1.0, %v3202_v29 }
 0x127   : > { %v4005_v36 = vpop.f32.mrf.mxu1  ;;  %v986_v38 = vsub.f32 0.0, %v862_v31  ;;  %v877_v40 = vadd.f32 %v2867_v35, %v3949_v48  ;;  %3227 = vrcp.f32 %v1088_v24  ;;  %v1042_v42 = vmul.f32 1.442695, %v987_v34 }
 0x128   : > { %4462 = vst [vmem:[#allocation8_spill] sm:$0xff] %v4005_v36  ;;  %v871_v43 = vpop.f32.mrf.mxu0  ;;  %v3206_v46 = vpop.eup %3205  ;;  %3229 = vpow2.f32 %v1036_v30  ;;  %v1093_v52 = vadd.f32 1.0, %v3204_v37 }
 0x129   : > { %v4008_v44 = vpop.f32.mrf.mxu1  ;;  %v1040_v47 = vmul.f32 1.442695, %v986_v38  ;;  %v989_v49 = vsub.f32 0.0, %v877_v40  ;;  %v872_v51 = vadd.f32 %v3949_v48, %v871_v43  ;;  %3231 = vrcp.f32 %v1091_v32 }
 0x12a   : > { %4463 = vst [vmem:[#allocation9_spill] sm:$0xff] %v4008_v44  ;;  %v2870_v54 = vpop.f32.mrf.mxu0  ;;  %v3208_v58 = vpop.eup %3207  ;;  %v1092_v59 = vadd.f32 1.0, %v3206_v46  ;;  %3233 = vpow2.f32 %v1042_v42 }
 0x12b   : > { %v4011_v56 = vpop.f32.mrf.mxu1  ;;  %v887_v60 = vadd.f32 %v2870_v54, %v3949_v48  ;;  %v4014_v61 = vpop.eup %3209  ;;  %3235 = vrcp.f32 %v1090_v41  ;;  %v1095_v63 = vadd.f32 1.0, %v3208_v58  ;;  %v988_v1 = vsub.f32 0.0, %v872_v51 }
 0x12c   : > { %v881_v2 = vpop.f32.mrf.mxu0  ;;  %v3212_v5 = vpop.eup %3211  ;;  %3237 = vpow2.f32 %v1040_v47  ;;  %v1046_v6 = vmul.f32 1.442695, %v989_v49 }
 0x12d   : > { %v4016_v4 = vpop.f32.mrf.mxu1  ;;  %v991_v7 = vsub.f32 0.0, %v887_v60  ;;  %v882_v10 = vadd.f32 %v3949_v48, %v881_v2  ;;  %v4019_v11 = vpop.eup %3213  ;;  %3239 = vrcp.f32 %v1093_v52  ;;  %v1094_v12 = vadd.f32 1.0, %v3212_v5 }
 0x12e   : > { %v2873_v14 = vpop.f32.mrf.mxu0  ;;  %v3216_v16 = vpop.eup %3215  ;;  %3241 = vrcp.f32 %v1092_v59  ;;  %v1044_v24 = vmul.f32 1.442695, %v988_v1 }
 0x12f   : > { %v4021_v15 = vpop.f32.mrf.mxu1  ;;  %v1050_v19 = vmul.f32 1.442695, %v991_v7  ;;  %v990_v20 = vsub.f32 0.0, %v882_v10  ;;  %v897_v21 = vadd.f32 %v2873_v14, %v3949_v48  ;;  %v4024_v22 = vpop.eup %3217  ;;  %3243 = vrcp.f32 %v1095_v63 }
 0x130   : > { %v891_v25 = vpop.f32.mrf.mxu0  ;;  %v3220_v29 = vpop.eup %3219  ;;  %3245 = vpow2.f32 %v1046_v6  ;;  %v1097_v35 = vadd.f32 1.0, %v3216_v16 }
 0x131   : > { %v4026_v26 = vpop.f32.mrf.mxu1  ;;  %v1048_v30 = vmul.f32 1.442695, %v990_v20  ;;  %v993_v31 = vsub.f32 0.0, %v897_v21  ;;  %v892_v32 = vadd.f32 %v3949_v48, %v891_v25  ;;  %v4029_v34 = vpop.eup %3221  ;;  %3247 = vrcp.f32 %v1094_v12 }
 0x132   : > { %v2876_v37 = vpop.f32.mrf.mxu0  ;;  %v3224_v40 = vpop.eup %3223  ;;  %3249 = vpow2.f32 %v1050_v19  ;;  %v1096_v47 = vadd.f32 1.0, %v3220_v29 }
 0x133   : > { %v4031_v38 = vpop.f32.mrf.mxu1  ;;  %v1054_v41 = vmul.f32 1.442695, %v993_v31  ;;  %v992_v42 = vsub.f32 0.0, %v892_v32  ;;  %v907_v43 = vadd.f32 %v2876_v37, %v3949_v48  ;;  %v4034_v46 = vpop.eup %3225  ;;  %3251 = vpow2.f32 %v1044_v24 }
 0x134   : > { %v901_v49 = vpop.f32.mrf.mxu0  ;;  %v4038_v52 = vpop.eup %3227  ;;  %3253 = vpow2.f32 %v1048_v30  ;;  %v1099_v63 = vadd.f32 1.0, %v3224_v40 }
 0x135   : > { %v4036_v51 = vpop.f32.mrf.mxu1  ;;  %v1052_v54 = vmul.f32 1.442695, %v992_v42  ;;  %v995_v58 = vsub.f32 0.0, %v907_v43  ;;  %v902_v59 = vadd.f32 %v3949_v48, %v901_v49  ;;  %v3230_v60 = vpop.eup %3229  ;;  %3255 = vrcp.f32 %v1097_v35 }
 0x136   : > { %v2879_v1 = vpop.f32.mrf.mxu0  ;;  %v4043_v5 = vpop.eup %3231  ;;  %3257 = vpow2.f32 %v1054_v41  ;;  %v1098_v20 = vadd.f32 1.0, %v3230_v60 }
 0x137   : > { %v4041_v2 = vpop.f32.mrf.mxu1  ;;  %v1058_v6 = vmul.f32 1.442695, %v995_v58  ;;  %v994_v7 = vsub.f32 0.0, %v902_v59  ;;  %v917_v10 = vadd.f32 %v2879_v1, %v3949_v48  ;;  %v3234_v12 = vpop.eup %3233  ;;  %3259 = vrcp.f32 %v1096_v47 }
 0x138   : > { %v911_v14 = vpop.f32.mrf.mxu0  ;;  %v4048_v19 = vpop.eup %3235  ;;  %3261 = vpow2.f32 %v1052_v54  ;;  %v1101_v35 = vadd.f32 1.0, %v3234_v12 }
 0x139   : > { %v4046_v16 = vpop.f32.mrf.mxu1  ;;  %v1056_v21 = vmul.f32 1.442695, %v994_v7  ;;  %v997_v24 = vsub.f32 0.0, %v917_v10  ;;  %v3238_v25 = vpop.eup %3237  ;;  %3263 = vpow2.f32 %v1058_v6  ;;  %v912_v29 = vadd.f32 %v3949_v48, %v911_v14 }
 0x13a   : > { %v2882_v30 = vpop.f32.mrf.mxu0  ;;  %v4053_v32 = vpop.eup %3239  ;;  %3265 = vrcp.f32 %v1099_v63  ;;  %v1100_v54 = vadd.f32 1.0, %v3238_v25 }
 0x13b   : > { %v4051_v31 = vpop.f32.mrf.mxu1  ;;  %v1062_v37 = vmul.f32 1.442695, %v997_v24  ;;  %v927_v40 = vadd.f32 %v2882_v30, %v3949_v48  ;;  %v4056_v41 = vpop.eup %3241  ;;  %3267 = vpow2.f32 %v1056_v21  ;;  %v996_v42 = vsub.f32 0.0, %v912_v29 }
 0x13c   : > { %v921_v43 = vpop.f32.mrf.mxu0  ;;  %v4060_v49 = vpop.eup %3243  ;;  %3269 = vrcp.f32 %v1098_v20 }
 0x13d   : > { %v4058_v47 = vpop.f32.mrf.mxu1  ;;  %v999_v58 = vsub.f32 0.0, %v927_v40  ;;  %v922_v59 = vadd.f32 %v3949_v48, %v921_v43  ;;  %v4063_v60 = vpop.eup %3245  ;;  %3271 = vpow2.f32 %v1062_v37  ;;  %v1060_v63 = vmul.f32 1.442695, %v996_v42 }
 0x13e   : > { %v2885_v1 = vpop.f32.mrf.mxu0  ;;  %v4067_v7 = vpop.eup %3247  ;;  %3273 = vrcp.f32 %v1101_v35 }
 0x13f   : > { %v4065_v6 = vpop.f32.mrf.mxu1  ;;  %v1066_v10 = vmul.f32 1.442695, %v999_v58  ;;  %v998_v12 = vsub.f32 0.0, %v922_v59  ;;  %v3250_v14 = vpop.eup %3249  ;;  %3275 = vpow2.f32 %v1060_v63  ;;  %v937_v20 = vadd.f32 %v2885_v1, %v3949_v48 }
 0x140   : > { %v931_v21 = vpop.f32.mrf.mxu0  ;;  %v4072_v25 = vpop.eup %3251  ;;  %3277 = vrcp.f32 %v1100_v54  ;;  %v1105_v29 = vadd.f32 1.0, %v3250_v14 }
 0x141   : > { %v4070_v24 = vpop.f32.mrf.mxu1  ;;  %v1064_v30 = vmul.f32 1.442695, %v998_v12  ;;  %v932_v37 = vadd.f32 %v3949_v48, %v931_v21  ;;  %v3254_v40 = vpop.eup %3253  ;;  %3279 = vpow2.f32 %v1066_v10  ;;  %v1001_v42 = vsub.f32 0.0, %v937_v20 }
 0x142   : > { %v2888_v35 = vpop.f32.mrf.mxu0  ;;  %v4077_v58 = vpop.eup %3255  ;;  %3281 = vrcp.f32 %v1105_v29  ;;  %v1104_v59 = vadd.f32 1.0, %v3254_v40 }
 0x143   : > { %v4075_v43 = vpop.f32.mrf.mxu1  ;;  %v1000_v63 = vsub.f32 0.0, %v932_v37  ;;  %v947_v1 = vadd.f32 %v2888_v35, %v3949_v48  ;;  %v3258_v44 = vpop.eup %3257  ;;  %3283 = vpow2.f32 %v1064_v30  ;;  %v1070_v54 = vmul.f32 1.442695, %v1001_v42 }
 0x144   : > { %v941_v14 = vpop.f32.mrf.mxu0  ;;  %v4082_v21 = vpop.eup %3259  ;;  %3285 = vrcp.f32 %v1104_v59  ;;  %v1107_v10 = vadd.f32 1.0, %v3258_v44 }
 0x145   : > { %v4080_v12 = vpop.f32.mrf.mxu1  ;;  %v1068_v20 = vmul.f32 1.442695, %v1000_v63  ;;  %v1003_v36 = vsub.f32 0.0, %v947_v1  ;;  %v3262_v27 = vpop.eup %3261  ;;  %3287 = vpow2.f32 %v1070_v54  ;;  %v942_v29 = vadd.f32 %v3949_v48, %v941_v14 }
 0x146   : > { %4464 = vst [vmem:[#allocation10_spill] sm:$0xff] %v4080_v12  ;;  %v2891_v40 = vpop.f32.mrf.mxu0  ;;  %v3264_v35 = vpop.eup %3263  ;;  %3289 = vrcp.f32 %v1107_v10  ;;  %v1106_v30 = vadd.f32 1.0, %v3262_v27 }
 0x147   : > { %v4085_v37 = vpop.f32.mrf.mxu1  ;;  %v1074_v42 = vmul.f32 1.442695, %v1003_v36  ;;  %v957_v17 = vadd.f32 %v2891_v40, %v3949_v48  ;;  %v4088_v9 = vpop.eup %3265  ;;  %v1109_v0 = vadd.f32 1.0, %v3264_v35  ;;  %3291 = vpow2.f32 %v1068_v20 }
 0x148   : > { %4465 = vst [vmem:[#allocation11_spill] sm:$0xff] %v4085_v37  ;;  %4466 = vst [vmem:[#allocation12_spill] sm:$0xff] %v4088_v9  ;;  %v1002_v44 = vsub.f32 0.0, %v942_v29  ;;  %v951_v59 = vpop.f32.mrf.mxu0  ;;  %v3268_v1 = vpop.eup %3267  ;;  %3293 = vrcp.f32 %v1106_v30 }
 0x149   : > { %v4090_v63 = vpop.f32.mrf.mxu1  ;;  %v1005_v54 = vsub.f32 0.0, %v957_v17  ;;  %v952_v14 = vadd.f32 %v3949_v48, %v951_v59  ;;  %v4093_v37 = vpop.eup %3269  ;;  %3295 = vrcp.f32 %v1109_v0  ;;  %v1108_v27 = vadd.f32 1.0, %v3268_v1  ;;  %v4106_v0 = vld [vmem:[%s4450_s2] ss:$0 sm:$0xff] }
 0x14a   : > { %4467 = vst [vmem:[#allocation13_spill] sm:$0xff] %v4090_v63  ;;  %4468 = vst [vmem:[#allocation14_spill] sm:$0xff] %v4093_v37  ;;  %v1072_v36 = vmul.f32 1.442695, %v1002_v44  ;;  %v2894_v10 = vpop.f32.mrf.mxu0  ;;  %v3272_v35 = vpop.eup %3271  ;;  %3297 = vpow2.f32 %v1074_v42 }
 0x14b   : > { %v4095_v40 = vpop.f32.mrf.mxu1  ;;  %v1078_v20 = vmul.f32 1.442695, %v1005_v54  ;;  %v1004_v29 = vsub.f32 0.0, %v952_v14  ;;  %v967_v63 = vadd.f32 %v2894_v10, %v3949_v48  ;;  %v4099_v9 = vpop.eup %3273  ;;  %3299 = vrcp.f32 %v1108_v27 }
 0x14c   : > { %4469 = vst [vmem:[#allocation15_spill] sm:$0xff] %v4095_v40  ;;  %4470 = vst [vmem:[#allocation16_spill] sm:$0xff] %v4099_v9  ;;  %v1111_v17 = vadd.f32 1.0, %v3272_v35  ;;  %v961_v30 = vpop.f32.mrf.mxu0  ;;  %v3276_v44 = vpop.eup %3275  ;;  %3301 = vpow2.f32 %v1072_v36 }
 0x14d   : > { %v4101_v59 = vpop.f32.mrf.mxu1  ;;  %v1076_v42 = vmul.f32 1.442695, %v1004_v29  ;;  %v1007_v1 = vsub.f32 0.0, %v967_v63  ;;  %v962_v54 = vadd.f32 %v3949_v48, %v961_v30  ;;  %v4109_v14 = vpop.eup %3277  ;;  %v1110_v10 = vadd.f32 1.0, %v3276_v44 }
 0x14e   : > { %4471 = vst [vmem:[#allocation17_spill] sm:$0xff] %v4101_v59  ;;  %4472 = vst [vmem:[#allocation18_spill] sm:$0xff] %v4109_v14  ;;  %3303 = vrcp.f32 %v1111_v17  ;;  %v3002_v27 = vpop.f32.mrf.mxu0  ;;  %v3280_v59 = vpop.eup %3279  ;;  %v4115_v63 = vadd.f32 1.0, %v4063_v60 }
 0x14f   : > { %v3032_v35 = vpop.f32.mrf.mxu1  ;;  %3305 = vpow2.f32 %v1078_v20  ;;  %v1082_v40 = vmul.f32 1.442695, %v1007_v1  ;;  %v1006_v9 = vsub.f32 0.0, %v962_v54  ;;  %v1731_v37 = vadd.f32 %v3002_v27, %v4106_v0  ;;  %v3282_v36 = vpop.eup %3281 }
 0x150   : > { %3307 = vrcp.f32 %v1110_v10  ;;  %v1113_v48 = vadd.f32 1.0, %v3280_v59  ;;  %v1831_v29 = vadd.f32 %v3032_v35, %v4106_v0  ;;  %v1725_v17 = vpop.f32.mrf.mxu0  ;;  %v3284_v44 = vpop.eup %3283 }
 0x151   : > { %v1825_v30 = vpop.f32.mrf.mxu1  ;;  %3309 = vpow2.f32 %v1076_v42  ;;  %v1080_v14 = vmul.f32 1.442695, %v1006_v9  ;;  %v1915_v12 = vmul.f32 %v4014_v61, %v1731_v37  ;;  %v1726_v20 = vadd.f32 %v4106_v0, %v1725_v17  ;;  %v3286_v1 = vpop.eup %3285 }
 0x152   : > { %3311 = vrcp.f32 %v1113_v48  ;;  %v1112_v54 = vadd.f32 1.0, %v3284_v44  ;;  %v1935_v27 = vmul.f32 %v3282_v36, %v1831_v29  ;;  %v1826_v60 = vadd.f32 %v4106_v0, %v1825_v30  ;;  %v3005_v55 = vpop.f32.mrf.mxu0  ;;  %v3288_v10 = vpop.eup %3287 }
 0x153   : > { %v3035_v59 = vpop.f32.mrf.mxu1  ;;  %3313 = vpow2.f32 %v1082_v40  ;;  %v1953_v35 = vadd.f32 %v3951_v50, %v1915_v12  ;;  %v1914_v42 = vmul.f32 %v4019_v11, %v1726_v20  ;;  %v1741_v9 = vadd.f32 %v3005_v55, %v4106_v0  ;;  %v3290_v61 = vpop.eup %3289 }
 0x154   : > { %3315 = vrcp.f32 %v1112_v54  ;;  %v1115_v37 = vadd.f32 1.0, %v3288_v10  ;;  %v1973_v48 = vadd.f32 %v4011_v56, %v1935_v27  ;;  %v1934_v17 = vmul.f32 %v3286_v1, %v1826_v60  ;;  %v1735_v36 = vpop.f32.mrf.mxu0  ;;  %v3292_v30 = vpop.eup %3291 }
 0x155   : > { %v1835_v29 = vpop.f32.mrf.mxu1  ;;  %3317 = vpow2.f32 %v1080_v14  ;;  %1992 = vst.msk [vmem:[%s4126_s13 + $0x8] sm:$0xff] %vm1990_vm2, %v1953_v35  ;;  %v1952_v50 = vadd.f32 %v1914_v42, %v3954_v53  ;;  %v1917_v55 = vmul.f32 %v4024_v22, %v1741_v9  ;;  %v1841_v11 = vadd.f32 %v3035_v59, %v4106_v0  ;;  %v3294_v12 = vpop.eup %3293 }
 0x156   : > { %3319 = vrcp.f32 %v1115_v37  ;;  %v1114_v56 = vadd.f32 1.0, %v3292_v30  ;;  %2012 = vst.msk [vmem:[%s4126_s13 + $0xa8] sm:$0xff] %vm1990_vm2, %v1973_v48  ;;  %v1972_v40 = vadd.f32 %v1934_v17, %v4016_v4  ;;  %v1736_v14 = vadd.f32 %v4106_v0, %v1735_v36  ;;  %v3008_v44 = vpop.f32.mrf.mxu0  ;;  %v3296_v1 = vpop.eup %3295 }
 0x157   : > { %v3038_v20 = vpop.f32.mrf.mxu1  ;;  %1991 = vst.msk [vmem:[%s4126_s13] sm:$0xff] %vm1990_vm2, %v1952_v50  ;;  %v1955_v53 = vadd.f32 %v3957_v57, %v1917_v55  ;;  %v1937_v22 = vmul.f32 %v3290_v61, %v1841_v11  ;;  %v1836_v54 = vadd.f32 %v4106_v0, %v1835_v29  ;;  %v1751_v27 = vadd.f32 %v3008_v44, %v4106_v0  ;;  %v3298_v60 = vpop.eup %3297 }
 0x158   : > { %v4143_v59 = vadd.f32 1.0, %v4072_v25  ;;  %3321 = vrcp.f32 %v1114_v56  ;;  %2011 = vst.msk [vmem:[%s4126_s13 + $0xa0] sm:$0xff] %vm1990_vm2, %v1972_v40  ;;  %v1916_v4 = vmul.f32 %v4029_v34, %v1736_v14  ;;  %v1851_v10 = vadd.f32 %v3038_v20, %v4106_v0  ;;  %v1745_v35 = vpop.f32.mrf.mxu0  ;;  %v3300_v9 = vpop.eup %3299 }
 0x159   : > { %v1845_v42 = vpop.f32.mrf.mxu1  ;;  %v1117_v57 = vadd.f32 1.0, %v3298_v60  ;;  %1994 = vst.msk [vmem:[%s4126_s13 + $0x18] sm:$0xff] %vm1990_vm2, %v1955_v53  ;;  %v1975_v61 = vadd.f32 %v4021_v15, %v1937_v22  ;;  %v1936_v37 = vmul.f32 %v3294_v12, %v1836_v54  ;;  %v1919_v25 = vmul.f32 %v4034_v46, %v1751_v27  ;;  %v3302_v48 = vpop.eup %3301 }
 0x15a   : > { %v1954_v17 = vadd.f32 %v1916_v4, %v3960_v62  ;;  %v1939_v36 = vmul.f32 %v3296_v1, %v1851_v10  ;;  %v1746_v34 = vadd.f32 %v4106_v0, %v1745_v35  ;;  %v1846_v29 = vadd.f32 %v4106_v0, %v1845_v42  ;;  %v3011_v30 = vpop.f32.mrf.mxu0 }
 0x15b   : > { %v3041_v50 = vpop.f32.mrf.mxu1  ;;  %v3304_v55 = vpop.eup %3303  ;;  %3323 = vrcp.f32 %v1117_v57  ;;  %v1116_v11 = vadd.f32 1.0, %v3302_v48  ;;  %2014 = vst.msk [vmem:[%s4126_s13 + $0xb8] sm:$0xff] %vm1990_vm2, %v1975_v61  ;;  %v1974_v15 = vadd.f32 %v1936_v37, %v4026_v26  ;;  %v1957_v46 = vadd.f32 %v3963_v3, %v1919_v25 }
 0x15c   : > { %v3306_v12 = vpop.eup %3305  ;;  %1993 = vst.msk [vmem:[%s4126_s13 + $0x10] sm:$0xff] %vm1990_vm2, %v1954_v17  ;;  %v1977_v62 = vadd.f32 %v4031_v38, %v1939_v36  ;;  %v1918_v56 = vmul.f32 %v4038_v52, %v1746_v34  ;;  %v1938_v40 = vmul.f32 %v3300_v9, %v1846_v29  ;;  %v1761_v14 = vadd.f32 %v3011_v30, %v4106_v0  ;;  %v1755_v44 = vpop.f32.mrf.mxu0 }
 0x15d   : > { %v1855_v20 = vpop.f32.mrf.mxu1  ;;  %v3308_v1 = vpop.eup %3307  ;;  %3325 = vrcp.f32 %v1116_v11  ;;  %v1119_v53 = vadd.f32 1.0, %v3306_v12  ;;  %2013 = vst.msk [vmem:[%s4126_s13 + $0xb0] sm:$0xff] %vm1990_vm2, %v1974_v15  ;;  %1996 = vst.msk [vmem:[%s4126_s13 + $0x28] sm:$0xff] %vm1990_vm2, %v1957_v46  ;;  %v1861_v3 = vadd.f32 %v3041_v50, %v4106_v0  ;;  %v1756_v26 = vadd.f32 %v4106_v0, %v1755_v44 }
 0x15e   : > { %v3310_v38 = vpop.eup %3309  ;;  %2016 = vst.msk [vmem:[%s4126_s13 + $0xc8] sm:$0xff] %vm1990_vm2, %v1977_v62  ;;  %v1956_v52 = vadd.f32 %v1918_v56, %v3966_v8  ;;  %v1976_v22 = vadd.f32 %v1938_v40, %v4036_v51  ;;  %v1921_v54 = vmul.f32 %v4043_v5, %v1761_v14  ;;  %v1856_v27 = vadd.f32 %v4106_v0, %v1855_v20  ;;  %v3014_v60 = vpop.f32.mrf.mxu0 }
 0x15f   : > { %v3044_v4 = vpop.f32.mrf.mxu1  ;;  %v3312_v10 = vpop.eup %3311  ;;  %3327 = vrcp.f32 %v1119_v53  ;;  %v1118_v35 = vadd.f32 1.0, %v3310_v38  ;;  %v1941_v42 = vmul.f32 %v3304_v55, %v1861_v3  ;;  %v1920_v9 = vmul.f32 %v4048_v19, %v1756_v26 }
 0x160   : > { %v3314_v57 = vpop.eup %3313  ;;  %1995 = vst.msk [vmem:[%s4126_s13 + $0x20] sm:$0xff] %vm1990_vm2, %v1956_v52  ;;  %2015 = vst.msk [vmem:[%s4126_s13 + $0xc0] sm:$0xff] %vm1990_vm2, %v1976_v22  ;;  %v1959_v8 = vadd.f32 %v3969_v13, %v1921_v54  ;;  %v1940_v51 = vmul.f32 %v3308_v1, %v1856_v27  ;;  %v1771_v5 = vadd.f32 %v3014_v60, %v4106_v0  ;;  %v1765_v37 = vpop.f32.mrf.mxu0 }
 0x161   : > { %v1871_v61 = vadd.f32 %v3044_v4, %v4106_v0  ;;  %v1865_v25 = vpop.f32.mrf.mxu1  ;;  %v3316_v48 = vpop.eup %3315  ;;  %3329 = vrcp.f32 %v1118_v35  ;;  %v1121_v19 = vadd.f32 1.0, %v3314_v57  ;;  %v1979_v17 = vadd.f32 %v4041_v2, %v1941_v42 }
 0x162   : > { %v1958_v36 = vadd.f32 %v1920_v9, %v3972_v18  ;;  %v3318_v34 = vpop.eup %3317  ;;  %1998 = vst.msk [vmem:[%s4126_s13 + $0x38] sm:$0xff] %vm1990_vm2, %v1959_v8  ;;  %v1978_v13 = vadd.f32 %v1940_v51, %v4046_v16  ;;  %v1923_v29 = vmul.f32 %v4053_v32, %v1771_v5  ;;  %v1766_v50 = vadd.f32 %v4106_v0, %v1765_v37  ;;  %v3017_v55 = vpop.f32.mrf.mxu0 }
 0x163   : > { %v1943_v30 = vmul.f32 %v3312_v10, %v1871_v61  ;;  %v3047_v11 = vpop.f32.mrf.mxu1  ;;  %v3320_v15 = vpop.eup %3319  ;;  %3331 = vrcp.f32 %v1121_v19  ;;  %v1120_v46 = vadd.f32 1.0, %v3318_v34  ;;  %2018 = vst.msk [vmem:[%s4126_s13 + $0xd8] sm:$0xff] %vm1990_vm2, %v1979_v17  ;;  %v1866_v18 = vadd.f32 %v4106_v0, %v1865_v25  ;;  %v4474_v25 = vld [vmem:[#allocation10_spill] sm:$0xff] }
 0x164   : > { %1997 = vst.msk [vmem:[%s4126_s13 + $0x30] sm:$0xff] %vm1990_vm2, %v1958_v36  ;;  %v1781_v2 = vadd.f32 %v3017_v55, %v4106_v0  ;;  %2017 = vst.msk [vmem:[%s4126_s13 + $0xd0] sm:$0xff] %vm1990_vm2, %v1978_v13  ;;  %v1961_v16 = vadd.f32 %v3975_v23, %v1923_v29  ;;  %v1922_v12 = vmul.f32 %v4056_v41, %v1766_v50  ;;  %v1775_v56 = vpop.f32.mrf.mxu0  ;;  %3333 = vrcp.f32 %v4115_v63  ;;  %v4477_v55 = vld [vmem:[#allocation14_spill] sm:$0xff] }
 0x165   : > { %v1981_v32 = vadd.f32 %v4051_v31, %v1943_v30  ;;  %v1881_v62 = vadd.f32 %v3047_v11, %v4106_v0  ;;  %v1875_v40 = vpop.f32.mrf.mxu1  ;;  %v3322_v14 = vpop.eup %3321  ;;  %v1942_v44 = vmul.f32 %v3316_v48, %v1866_v18  ;;  %v1776_v1 = vadd.f32 %v4106_v0, %v1775_v56  ;;  %v4475_v48 = vld [vmem:[#allocation12_spill] sm:$0xff]  ;;  %v4479_v56 = vld [vmem:[#allocation5_spill] sm:$0xff] }
 0x166   : > { %v1925_v20 = vmul.f32 %v4060_v49, %v1781_v2  ;;  %3335 = vrcp.f32 %v1120_v46  ;;  %2000 = vst.msk [vmem:[%s4126_s13 + $0x48] sm:$0xff] %vm1990_vm2, %v1961_v16  ;;  %v1960_v23 = vadd.f32 %v1922_v12, %v3978_v28  ;;  %v1876_v41 = vadd.f32 %v4106_v0, %v1875_v40  ;;  %v3020_v53 = vpop.f32.mrf.mxu0  ;;  %v4476_v30 = vld [vmem:[#allocation4_spill] sm:$0xff]  ;;  %v4478_v2 = vld [vmem:[#allocation11_spill] sm:$0xff] }
 0x167   : > { %2020 = vst.msk [vmem:[%s4126_s13 + $0xe8] sm:$0xff] %vm1990_vm2, %v1981_v32  ;;  %v1945_v31 = vmul.f32 %v3320_v15, %v1881_v62  ;;  %v3050_v63 = vpop.f32.mrf.mxu1  ;;  %v1980_v3 = vadd.f32 %v1942_v44, %v4058_v47  ;;  %v1924_v26 = vmul.f32 %v4067_v7, %v1776_v1  ;;  %v1791_v38 = vadd.f32 %v3020_v53, %v4106_v0 }
 0x168   : > { %v1963_v49 = vadd.f32 %v3981_v33, %v1925_v20  ;;  %v3324_v52 = vpop.eup %3323  ;;  %3337 = vrcp.f32 %v4143_v59  ;;  %1999 = vst.msk [vmem:[%s4126_s13 + $0x40] sm:$0xff] %vm1990_vm2, %v1960_v23  ;;  %v1944_v22 = vmul.f32 %v3322_v14, %v1876_v41  ;;  %v1891_v54 = vadd.f32 %v3050_v63, %v4106_v0  ;;  %v1785_v27 = vpop.f32.mrf.mxu0  ;;  %v4480_v14 = vld [vmem:[#allocation16_spill] sm:$0xff] }
 0x169   : > { %v1983_v28 = vadd.f32 %v4065_v6, %v1945_v31  ;;  %v1885_v47 = vpop.f32.mrf.mxu1  ;;  %2019 = vst.msk [vmem:[%s4126_s13 + $0xe0] sm:$0xff] %vm1990_vm2, %v1980_v3  ;;  %v1962_v33 = vadd.f32 %v1924_v26, %v3984_v39  ;;  %v1927_v7 = vmul.f32 %v4077_v58, %v1791_v38  ;;  %v1786_v59 = vadd.f32 %v4106_v0, %v1785_v27  ;;  %v4481_v31 = vld [vmem:[#allocation13_spill] sm:$0xff]  ;;  %v4483_v38 = vld [vmem:[#allocation15_spill] sm:$0xff] }
 0x16a   : > { %2002 = vst.msk [vmem:[%s4126_s13 + $0x58] sm:$0xff] %vm1990_vm2, %v1963_v49  ;;  %v1886_v60 = vadd.f32 %v4106_v0, %v1885_v47  ;;  %v3326_v6 = vpop.eup %3325  ;;  %v1982_v4 = vadd.f32 %v1944_v22, %v4070_v24  ;;  %v1947_v10 = vmul.f32 %v3324_v52, %v1891_v54  ;;  %v3023_v35 = vpop.f32.mrf.mxu0  ;;  %v4482_v49 = vld [vmem:[#allocation6_spill] sm:$0xff] }
 0x16b   : > { %2022 = vst.msk [vmem:[%s4126_s13 + $0xf8] sm:$0xff] %vm1990_vm2, %v1983_v28  ;;  %v3053_v42 = vpop.f32.mrf.mxu1  ;;  %2001 = vst.msk [vmem:[%s4126_s13 + $0x50] sm:$0xff] %vm1990_vm2, %v1962_v33  ;;  %v1965_v39 = vadd.f32 %v3987_v45, %v1927_v7  ;;  %v1926_v58 = vmul.f32 %v4082_v21, %v1786_v59  ;;  %v1801_v57 = vadd.f32 %v3023_v35, %v4106_v0  ;;  %v4473_v45 = vld [vmem:[#allocation3_spill] sm:$0xff]  ;;  %v4484_v28 = vld [vmem:[#allocation18_spill] sm:$0xff] }
 0x16c   : > { %v1946_v9 = vmul.f32 %v3326_v6, %v1886_v60  ;;  %v3328_v8 = vpop.eup %3327  ;;  %2021 = vst.msk [vmem:[%s4126_s13 + $0xf0] sm:$0xff] %vm1990_vm2, %v1982_v4  ;;  %v1985_v51 = vadd.f32 %v4075_v43, %v1947_v10  ;;  %v1901_v24 = vadd.f32 %v3053_v42, %v4106_v0  ;;  %v1795_v5 = vpop.f32.mrf.mxu0  ;;  %v4485_v7 = vld [vmem:[#allocation7_spill] sm:$0xff]  ;;  %v4486_v4 = vld [vmem:[#allocation17_spill] sm:$0xff]  ;;  %v4487_v35 = vld [vmem:[#allocation8_spill] sm:$0xff] }
 0x16d   : > { %v1895_v61 = vpop.f32.mrf.mxu1  ;;  %2004 = vst.msk [vmem:[%s4126_s13 + $0x68] sm:$0xff] %vm1990_vm2, %v1965_v39  ;;  %v1964_v37 = vadd.f32 %v1926_v58, %v4473_v45  ;;  %v1929_v19 = vmul.f32 %v4475_v48, %v1801_v57  ;;  %v1796_v17 = vadd.f32 %v4106_v0, %v1795_v5  ;;  %v4488_v58 = vld [vmem:[#allocation9_spill] sm:$0xff] }
 0x16e   : > { %v1984_v21 = vadd.f32 %v1946_v9, %v4474_v25  ;;  %v3330_v36 = vpop.eup %3329  ;;  %2024 = vst.msk [vmem:[%s4126_s13 + $0x108] sm:$0xff] %vm1990_vm2, %v1985_v51  ;;  %v1949_v43 = vmul.f32 %v3328_v8, %v1901_v24  ;;  %v1896_v34 = vadd.f32 %v4106_v0, %v1895_v61  ;;  %v3026_v13 = vpop.f32.mrf.mxu0 }
 0x16f   : > { %v3056_v29 = vpop.f32.mrf.mxu1  ;;  %2003 = vst.msk [vmem:[%s4126_s13 + $0x60] sm:$0xff] %vm1990_vm2, %v1964_v37  ;;  %v1967_v50 = vadd.f32 %v4476_v30, %v1929_v19  ;;  %v1928_v11 = vmul.f32 %v4477_v55, %v1796_v17  ;;  %v1811_v15 = vadd.f32 %v3026_v13, %v4106_v0 }
 0x170   : > { %2023 = vst.msk [vmem:[%s4126_s13 + $0x100] sm:$0xff] %vm1990_vm2, %v1984_v21  ;;  %v1911_v46 = vadd.f32 %v3056_v29, %v4106_v0  ;;  %v3332_v18 = vpop.eup %3331  ;;  %v1987_v16 = vadd.f32 %v4478_v2, %v1949_v43  ;;  %v1948_v32 = vmul.f32 %v3330_v36, %v1896_v34  ;;  %v1805_v12 = vpop.f32.mrf.mxu0 }
 0x171   : > { %v1905_v62 = vpop.f32.mrf.mxu1  ;;  %2006 = vst.msk [vmem:[%s4126_s13 + $0x78] sm:$0xff] %vm1990_vm2, %v1967_v50  ;;  %v1966_v40 = vadd.f32 %v1928_v11, %v4479_v56  ;;  %v1931_v44 = vmul.f32 %v4480_v14, %v1811_v15  ;;  %v1806_v1 = vadd.f32 %v4106_v0, %v1805_v12  ;;  %v3334_v23 = vpop.eup %3333 }
 0x172   : > { %v1951_v20 = vmul.f32 %v3332_v18, %v1911_v46  ;;  %2026 = vst.msk [vmem:[%s4126_s13 + $0x118] sm:$0xff] %vm1990_vm2, %v1987_v16  ;;  %v1986_v41 = vadd.f32 %v1948_v32, %v4481_v31  ;;  %v1906_v53 = vadd.f32 %v4106_v0, %v1905_v62  ;;  %v3029_v63 = vpop.f32.mrf.mxu0 }
 0x173   : > { %v3336_v3 = vpop.eup %3335  ;;  %2005 = vst.msk [vmem:[%s4126_s13 + $0x70] sm:$0xff] %vm1990_vm2, %v1966_v40  ;;  %v1969_v26 = vadd.f32 %v4482_v49, %v1931_v44  ;;  %v1930_v22 = vmul.f32 %v4484_v28, %v1806_v1  ;;  %v1821_v54 = vadd.f32 %v3029_v63, %v4106_v0 }
 0x174   : > { %v1989_v52 = vadd.f32 %v4483_v38, %v1951_v20  ;;  %2025 = vst.msk [vmem:[%s4126_s13 + $0x110] sm:$0xff] %vm1990_vm2, %v1986_v41  ;;  %v1950_v27 = vmul.f32 %v3336_v3, %v1906_v53  ;;  %v1815_v47 = vpop.f32.mrf.mxu0 }
 0x175   : > { %v3338_v33 = vpop.eup %3337  ;;  %2008 = vst.msk [vmem:[%s4126_s13 + $0x88] sm:$0xff] %vm1990_vm2, %v1969_v26  ;;  %v1968_v59 = vadd.f32 %v1930_v22, %v4485_v7  ;;  %v1933_v60 = vmul.f32 %v3334_v23, %v1821_v54  ;;  %v1816_v6 = vadd.f32 %v4106_v0, %v1815_v47 }
 0x176   : > { %2028 = vst.msk [vmem:[%s4126_s13 + $0x128] sm:$0xff] %vm1990_vm2, %v1989_v52  ;;  %v1988_v10 = vadd.f32 %v1950_v27, %v4486_v4 }
 0x177   : > { %2007 = vst.msk [vmem:[%s4126_s13 + $0x80] sm:$0xff] %vm1990_vm2, %v1968_v59  ;;  %v1971_v42 = vadd.f32 %v4487_v35, %v1933_v60  ;;  %v1932_v39 = vmul.f32 %v3338_v33, %v1816_v6  ;;  %2035 = sbr.rel (!%p3519_p3) target bundleno = 445 (0x1bd), region = 52 }
 0x178   : > { %2027 = vst.msk [vmem:[%s4126_s13 + $0x120] sm:$0xff] %vm1990_vm2, %v1988_v10 }
 0x179   : > { %2010 = vst.msk [vmem:[%s4126_s13 + $0x98] sm:$0xff] %vm1990_vm2, %v1971_v42  ;;  %v1970_v9 = vadd.f32 %v1932_v39, %v4488_v58 }
 0x17b   : > { %2009 = vst.msk [vmem:[%s4126_s13 + $0x90] sm:$0xff] %vm1990_vm2, %v1970_v9 }
 0x17c   : > { %s4501_s15 = smov (!%p2038_p9, %s2037_s15), 38 }
 0x17d   : > { %s2651_s21 = sshll.u32 %s4501_s15, 7 }
 0x17e   : > { %p2654_p10 = scmp.eq.s32.totalorder %s2651_s21, 0 }
 0x17f   : > { %3339 = sdivrem.u32 (!%p2654_p10), %s4501_s15, 38 }
 0x180   : > { %2047 = sbr.rel (%p2654_p10) target bundleno = 445 (0x1bd), region = 56 }
 0x188   : > { %s4307_s9 = spop.drf %3339 }
 0x189   : > { %p2655_p11 = scmp.le.s32.totalorder %s4307_s9, 0 }
 0x18a   : > { %s4489_s26 = smov (!%p2655_p11), %s4301_s20  ;;  %s4490_s18 = smov (!%p2655_p11), %s4126_s13 }
 0x18b   : > { %2384 = sbr.rel (%p2655_p11) target bundleno = 420 (0x1a4), region = 150  ;;  %s4316_s22 = smov (!%p2655_p11), 0  }
 0x18c   : > { %s4318_s23 = smov (!%p2655_p11), 0  }
 0x190 LB: >> { %v2186_v0 = vld [vmem:[%s3421_s18] sm:$0xff]  ;;  %v2188_v57 = vld [vmem:[%s3421_s18 + $0x8] sm:$0xff]  ;;  %v2190_v8 = vld [vmem:[%s3421_s18 + $0x10] sm:$0xff]  ;;  %s2262_s8 = sadd.s32 1, %s3425_s22  ;;  %s2180_s23 = sadd.s32 1, %s3429_s23   ;;  %s3429_s23 = sphi %s4318_s23, %s2180_s23   ;;  %s3425_s22 = sphi %s4316_s22, %s4493_s22   ;;  %s3421_s18 = sphi %s4490_s18, %s4492_s18   ;;  %s3417_s26 = sphi %s4489_s26, %s4491_s26  }
 0x191   : >> { %2187 = vst [vmem:[%s3417_s26] sm:$0xff] %v2186_v0  ;;  %2189 = vst [vmem:[%s3417_s26 + $0x8] sm:$0xff] %v2188_v57  ;;  %v2192_v51 = vld [vmem:[%s3421_s18 + $0x18] sm:$0xff]  ;;  %v2194_v24 = vld [vmem:[%s3421_s18 + $0x20] sm:$0xff]  ;;  %p2263_p12 = scmp.ge.s32.totalorder %s2262_s8, %s4307_s9  ;;  %p2179_p13 = scmp.ge.s32.totalorder %s2180_s23, %s4307_s9 }
 0x192   : >> { %2191 = vst [vmem:[%s3417_s26 + $0x10] sm:$0xff] %v2190_v8  ;;  %v2196_v5 = vld [vmem:[%s3421_s18 + $0x28] sm:$0xff]  ;;  %2193 = vst [vmem:[%s3417_s26 + $0x18] sm:$0xff] %v2192_v51  ;;  %v2198_v61 = vld [vmem:[%s3421_s18 + $0x30] sm:$0xff] }
 0x193   : >> { %2195 = vst [vmem:[%s3417_s26 + $0x20] sm:$0xff] %v2194_v24  ;;  %2197 = vst [vmem:[%s3417_s26 + $0x28] sm:$0xff] %v2196_v5  ;;  %v2200_v45 = vld [vmem:[%s3421_s18 + $0x38] sm:$0xff]  ;;  %v2202_v37 = vld [vmem:[%s3421_s18 + $0x40] sm:$0xff]  ;;  %s4503_s8 = smov (%p2263_p12, %s2262_s8), 0 }
 0x194   : >> { %2199 = vst [vmem:[%s3417_s26 + $0x30] sm:$0xff] %v2198_v61  ;;  %2201 = vst [vmem:[%s3417_s26 + $0x38] sm:$0xff] %v2200_v45  ;;  %v2204_v25 = vld [vmem:[%s3421_s18 + $0x48] sm:$0xff]  ;;  %v2206_v21 = vld [vmem:[%s3421_s18 + $0x50] sm:$0xff]  ;;  %s2265_s10 = smul.u32 304, %s4503_s8  ;;  %s4493_s22 = smov %s4503_s8 }
 0x195   : >> { %2203 = vst [vmem:[%s3417_s26 + $0x40] sm:$0xff] %v2202_v37  ;;  %v2208_v48 = vld [vmem:[%s3421_s18 + $0x58] sm:$0xff]  ;;  %2205 = vst [vmem:[%s3417_s26 + $0x48] sm:$0xff] %v2204_v25  ;;  %v2210_v19 = vld [vmem:[%s3421_s18 + $0x60] sm:$0xff] }
 0x196   : >> { %2207 = vst [vmem:[%s3417_s26 + $0x50] sm:$0xff] %v2206_v21  ;;  %2209 = vst [vmem:[%s3417_s26 + $0x58] sm:$0xff] %v2208_v48  ;;  %v2212_v17 = vld [vmem:[%s3421_s18 + $0x68] sm:$0xff]  ;;  %v2214_v36 = vld [vmem:[%s3421_s18 + $0x70] sm:$0xff]  ;;  %s4380_s14 = scalar_lea.vmem %s4126_s13, %s2265_s10 [#allocation2]   ;;  %s4383_s29 = scalar_lea.vmem %s4301_s20, %s2265_s10  }
 0x197   : >> { %2211 = vst [vmem:[%s3417_s26 + $0x60] sm:$0xff] %v2210_v19  ;;  %2213 = vst [vmem:[%s3417_s26 + $0x68] sm:$0xff] %v2212_v17  ;;  %v2216_v43 = vld [vmem:[%s3421_s18 + $0x78] sm:$0xff]  ;;  %v2218_v34 = vld [vmem:[%s3421_s18 + $0x80] sm:$0xff] }
 0x198   : >> { %2215 = vst [vmem:[%s3417_s26 + $0x70] sm:$0xff] %v2214_v36  ;;  %v2220_v13 = vld [vmem:[%s3421_s18 + $0x88] sm:$0xff]  ;;  %2217 = vst [vmem:[%s3417_s26 + $0x78] sm:$0xff] %v2216_v43  ;;  %v2222_v29 = vld [vmem:[%s3421_s18 + $0x90] sm:$0xff] }
 0x199   : >> { %2219 = vst [vmem:[%s3417_s26 + $0x80] sm:$0xff] %v2218_v34  ;;  %2221 = vst [vmem:[%s3417_s26 + $0x88] sm:$0xff] %v2220_v13  ;;  %v2224_v30 = vld [vmem:[%s3421_s18 + $0x98] sm:$0xff]  ;;  %v2226_v50 = vld [vmem:[%s3421_s18 + $0xa0] sm:$0xff] }
 0x19a   : >> { %2223 = vst [vmem:[%s3417_s26 + $0x90] sm:$0xff] %v2222_v29  ;;  %2225 = vst [vmem:[%s3417_s26 + $0x98] sm:$0xff] %v2224_v30  ;;  %v2228_v55 = vld [vmem:[%s3421_s18 + $0xa8] sm:$0xff]  ;;  %v2230_v11 = vld [vmem:[%s3421_s18 + $0xb0] sm:$0xff] }
 0x19b   : >> { %2227 = vst [vmem:[%s3417_s26 + $0xa0] sm:$0xff] %v2226_v50  ;;  %v2232_v15 = vld [vmem:[%s3421_s18 + $0xb8] sm:$0xff]  ;;  %2229 = vst [vmem:[%s3417_s26 + $0xa8] sm:$0xff] %v2228_v55  ;;  %v2234_v46 = vld [vmem:[%s3421_s18 + $0xc0] sm:$0xff] }
 0x19c   : >> { %2231 = vst [vmem:[%s3417_s26 + $0xb0] sm:$0xff] %v2230_v11  ;;  %2233 = vst [vmem:[%s3417_s26 + $0xb8] sm:$0xff] %v2232_v15  ;;  %v2236_v18 = vld [vmem:[%s3421_s18 + $0xc8] sm:$0xff]  ;;  %v2238_v2 = vld [vmem:[%s3421_s18 + $0xd0] sm:$0xff] }
 0x19d   : >> { %2235 = vst [vmem:[%s3417_s26 + $0xc0] sm:$0xff] %v2234_v46  ;;  %2237 = vst [vmem:[%s3417_s26 + $0xc8] sm:$0xff] %v2236_v18  ;;  %v2240_v16 = vld [vmem:[%s3421_s18 + $0xd8] sm:$0xff]  ;;  %v2242_v32 = vld [vmem:[%s3421_s18 + $0xe0] sm:$0xff] }
 0x19e   : >> { %2239 = vst [vmem:[%s3417_s26 + $0xd0] sm:$0xff] %v2238_v2  ;;  %v2244_v12 = vld [vmem:[%s3421_s18 + $0xe8] sm:$0xff]  ;;  %2241 = vst [vmem:[%s3417_s26 + $0xd8] sm:$0xff] %v2240_v16  ;;  %v2246_v62 = vld [vmem:[%s3421_s18 + $0xf0] sm:$0xff] }
 0x19f   : >> { %2243 = vst [vmem:[%s3417_s26 + $0xe0] sm:$0xff] %v2242_v32  ;;  %2245 = vst [vmem:[%s3417_s26 + $0xe8] sm:$0xff] %v2244_v12  ;;  %v2248_v56 = vld [vmem:[%s3421_s18 + $0xf8] sm:$0xff]  ;;  %v2250_v40 = vld [vmem:[%s3421_s18 + $0x100] sm:$0xff]  ;;  %2182 = sbr.rel (!%p2179_p13) target bundleno = 400 (0x190), region = 156 }
 0x1a0   : >> { %2247 = vst [vmem:[%s3417_s26 + $0xf0] sm:$0xff] %v2246_v62  ;;  %2249 = vst [vmem:[%s3417_s26 + $0xf8] sm:$0xff] %v2248_v56  ;;  %v2252_v14 = vld [vmem:[%s3421_s18 + $0x108] sm:$0xff]  ;;  %v2254_v44 = vld [vmem:[%s3421_s18 + $0x110] sm:$0xff] }
 0x1a1   : >> { %2251 = vst [vmem:[%s3417_s26 + $0x100] sm:$0xff] %v2250_v40  ;;  %v2256_v20 = vld [vmem:[%s3421_s18 + $0x118] sm:$0xff]  ;;  %2253 = vst [vmem:[%s3417_s26 + $0x108] sm:$0xff] %v2252_v14  ;;  %v2258_v1 = vld [vmem:[%s3421_s18 + $0x120] sm:$0xff] }
 0x1a2   : >> { %2255 = vst [vmem:[%s3417_s26 + $0x110] sm:$0xff] %v2254_v44  ;;  %2257 = vst [vmem:[%s3417_s26 + $0x118] sm:$0xff] %v2256_v20  ;;  %v2260_v23 = vld [vmem:[%s3421_s18 + $0x128] sm:$0xff]  ;;  %s4492_s18 = smov %s4380_s14 }
 0x1a3   : >> { %2259 = vst [vmem:[%s3417_s26 + $0x120] sm:$0xff] %v2258_v1  ;;  %2261 = vst [vmem:[%s3417_s26 + $0x128] sm:$0xff] %v2260_v23  ;;  %s4491_s26 = smov %s4383_s29 }
 0x1a4 PF: > { %3341 = sdivrem.u32 %s4501_s15, 38 }
 0x1a5   : > { %s2656_s12 = smul.u32 304, %s4307_s9 }
 0x1a7   : > { %s2273_s24 = scalar_lea.vmem %s4126_s13, %s2656_s12 [#allocation2]   ;;  %s2275_s16 = scalar_lea.vmem %s4301_s20, %s2656_s12  }
 0x1ad   : > { %s3342_s17 = spop.drf %3341 }
 0x1ae   : > { %p2658_p0 = scmp.le.s32.totalorder %s3342_s17, 0 }
 0x1af   : > { %s3431_s19 = smov (!%p2658_p0), %s2275_s16   ;;  %s3435_s21 = smov (!%p2658_p0), %s2273_s24  }
 0x1b0   : > { %2398 = sbr.rel (%p2658_p0) target bundleno = 445 (0x1bd), region = 161  ;;  %s3439_s10 = smov (!%p2658_p0), 0  }
 0x1b1   : > { %s3443_s14 = smov (!%p2658_p0), 0  }
 0x1b5 LB: >> { %v2285_v31 = vld [vmem:[%s3437_s21] sm:$0xff]  ;;  %s2287_s26 = sadd.s32 1, %s3441_s10  ;;  %s2279_s14 = sadd.s32 1, %s3445_s14   ;;  %s3445_s14 = sphi %s3443_s14, %s2279_s14   ;;  %s3441_s10 = sphi %s3439_s10, %s3440_s10   ;;  %s3437_s21 = sphi %s3435_s21, %s2292_s21   ;;  %s3433_s19 = sphi %s3431_s19, %s2293_s19  }
 0x1b6   : >> { %2286 = vst [vmem:[%s3433_s19] sm:$0xff] %v2285_v31  ;;  %p2288_p1 = scmp.ge.s32.totalorder %s2287_s26, %s3342_s17  ;;  %p2278_p2 = scmp.ge.s32.totalorder %s2279_s14, %s3342_s17 }
 0x1b8   : >> { %s4505_s26 = smov (%p2288_p1, %s2287_s26), 0  ;;  %2281 = sbr.rel (!%p2278_p2) target bundleno = 437 (0x1b5), region = 167 }
 0x1b9   : >> { %s2659_s13 = sshll.u32 %s4505_s26, 3  ;;  %s3440_s10 = smov %s4505_s26  }
 0x1ba   : >> { %s2292_s21 = scalar_lea.vmem %s2273_s24, %s2659_s13 [#allocation2]   ;;  %s2293_s19 = scalar_lea.vmem %s2275_s16, %s2659_s13  }
 0x1bd PF: > { %s17_s28 = sadd.s32 1, %s3413_s28   ;;  %s4494_s24 = smov %s3401_s25 }
 0x1be   : > { %p14_p3 = scmp.ge.s32.totalorder %s17_s28, 4   ;;  %s4495_s25 = smov %s3528_s11 }
 0x1bf   : > { %s4496_s26 = smov %s3409_s27  ;;  %s4497_s27 = smov %s4499_s30 }
 0x1c0   :  { %16 = sbr.rel (!%p14_p3) target bundleno = 3 (0x3), region = 178 }

</bundles_post_ra>
